<compile_context>
chip_gen: v5e
topology: v5e:2x2
jax: 0.10.0
libtpu: 0.0.40
codegen_flags: <defaults>
</compile_context>

<pallas_src>
import functools

import jax
import jax.numpy as jnp
from jax import lax
from jax.experimental import pallas as pl
from jax.experimental.pallas import tpu as pltpu

LANE = 128
NEG_INF = -1e30  # finite "−inf" so exp() never sees a NaN-producing −inf − −inf


def _round_up(x, m):
    return ((x + m - 1) // m) * m


def _pick_tile(n_pad, pref=256):
    # n_pad is a multiple of 128; use 256-row tiles when they divide evenly.
    return pref if n_pad % pref == 0 else LANE


def _vmem_limit_bytes():
    try:
        cap = int(pltpu.get_tpu_info().vmem_capacity_bytes)
    except Exception:  # pragma: no cover - conservative fallback (v7x-sized)
        cap = 64 << 20
    # ~3/4 of physical (96 MiB on v5e/v6e, 48 MiB on v7x), capped at 100 MiB.
    return int(min(100 << 20, (cap * 3) // 4))


def _cparams(dims, vmem_limit):
    return pltpu.CompilerParams(dimension_semantics=dims,
                                vmem_limit_bytes=vmem_limit)


def _cost(flops, bytes_accessed, transcendentals=0):
    return pl.CostEstimate(flops=int(flops), transcendentals=int(transcendentals),
                           bytes_accessed=int(bytes_accessed))


def _mm(a, b):
    # a @ b with bf16 operands on the MXU, f32 accumulation.
    return lax.dot_general(a.astype(jnp.bfloat16), b.astype(jnp.bfloat16),
                           dimension_numbers=(((1,), (0,)), ((), ())),
                           preferred_element_type=jnp.float32)


def _mm_nt(a, b):
    # a @ b.T without materializing the transpose (contract the last dims).
    return lax.dot_general(a.astype(jnp.bfloat16), b.astype(jnp.bfloat16),
                           dimension_numbers=(((1,), (1,)), ((), ())),
                           preferred_element_type=jnp.float32)


# ----------------------------------------------------------------------------
# Kernels
# ----------------------------------------------------------------------------
def _feat_kernel(x_ref, w_ref, o_ref):
    """Row-local feature transform: o = x @ w."""
    o_ref[...] = _mm(x_ref[...], w_ref[...]).astype(o_ref.dtype)


def _proj_qv_kernel(x_ref, wqv_ref, q_ref, v_ref):
    """Packed Q|V projection: one 256-lane MXU matmul, split into Q and V."""
    do = q_ref.shape[-1]
    qv = _mm(x_ref[...], wqv_ref[...])
    q_ref[...] = qv[:, :do].astype(q_ref.dtype)
    v_ref[...] = qv[:, do:].astype(v_ref.dtype)


def _agg_hidden_kernel(a_ref, z_ref, b_ref, w2_ref, o_ref, acc_ref):
    """Layer-1 aggregation: acc += A[i,k] @ Z1[k]; epilogue relu(acc+b1) @ W2."""
    k = pl.program_id(1)

    @pl.when(k == 0)
    def _():
        acc_ref[...] = jnp.zeros_like(acc_ref)

    acc_ref[...] += _mm(a_ref[...], z_ref[...])

    @pl.when(k == pl.num_programs(1) - 1)
    def _():
        h = jnp.maximum(acc_ref[...] + b_ref[...], 0.0)       # bias + ReLU
        o_ref[...] = _mm(h, w2_ref[...]).astype(o_ref.dtype)  # fused H @ W2


def _agg_out_kernel(a_ref, z_ref, b_ref, o_ref, acc_ref):
    """Layer-2 aggregation: acc += A[i,k] @ Z2[k]; epilogue acc + b2."""
    k = pl.program_id(1)

    @pl.when(k == 0)
    def _():
        acc_ref[...] = jnp.zeros_like(acc_ref)

    acc_ref[...] += _mm(a_ref[...], z_ref[...])

    @pl.when(k == pl.num_programs(1) - 1)
    def _():
        o_ref[...] = (acc_ref[...] + b_ref[...]).astype(o_ref.dtype)


def _attn_kernel(q_ref, k_ref, v_ref, o_ref, *, n_valid):
    """Per query-row-tile cross attention: softmax(leaky_relu(Q K^T)) @ V."""
    q = q_ref[...]                         # (tq, do_pad) bf16
    k = k_ref[...]                         # (n_pad, do_pad) bf16
    v = v_ref[...]                         # (n_pad, do_pad) bf16
    e = _mm_nt(q, k)                       # Q @ K^T, f32
    e = jnp.maximum(e, 0.01 * e)           # leaky_relu (slope 0.01)
    n_pad = k.shape[0]
    if n_valid < n_pad:                    # mask zero-padded key columns
        col = lax.broadcasted_iota(jnp.int32, e.shape, 1)
        e = jnp.where(col < n_valid, e, NEG_INF)
    e = e - jnp.max(e, axis=-1, keepdims=True)
    p = jnp.exp(e)
    denom = jnp.sum(p, axis=-1, keepdims=True)
    p = p * pl.reciprocal(denom, approx=True)          # EUP reciprocal
    o_ref[...] = _mm(p, v).astype(o_ref.dtype)


def _logits_kernel(x1i_ref, x1j_ref, x2i_ref, x2j_ref, o_ref, *, mode):
    if mode == "average":
        s_i = x1i_ref[...] + x2i_ref[...]
        s_j = x1j_ref[...] + x2j_ref[...]
        # 0.25*(o1 o1^T + o2 o2^T + o1 o2^T + o2 o1^T) == 0.25*(o1+o2)(o1+o2)^T
        o_ref[...] = 0.25 * _mm_nt(s_i, s_j)
    else:  # 'simple' and 'cross' use the same combine
        o_ref[...] = 0.5 * (_mm_nt(x1i_ref[...], x2j_ref[...]) +
                            _mm_nt(x2i_ref[...], x1j_ref[...]))


# ----------------------------------------------------------------------------
# pallas_call wrappers
# ----------------------------------------------------------------------------
def _feat(x, w, *, row_tile, vmem):
    n_pad, d_in = x.shape
    d_out = w.shape[1]
    return pl.pallas_call(
        _feat_kernel,
        out_shape=jax.ShapeDtypeStruct((n_pad, d_out), jnp.bfloat16),
        grid_spec=pltpu.PrefetchScalarGridSpec(
            num_scalar_prefetch=0, grid=(n_pad // row_tile,),
            in_specs=[pl.BlockSpec((row_tile, d_in), lambda i: (i, 0)),
                      pl.BlockSpec((d_in, d_out), lambda i: (0, 0))],
            out_specs=pl.BlockSpec((row_tile, d_out), lambda i: (i, 0))),
        compiler_params=_cparams(("parallel",), vmem),
        cost_estimate=_cost(2 * n_pad * d_in * d_out,
                            n_pad * d_in * 2 + d_in * d_out * 2 + n_pad * d_out * 2),
    )(x, w)


def _proj_qv(x, wqv, *, row_tile, vmem):
    n_pad, d_in = x.shape
    do2 = wqv.shape[1]
    do_pad = do2 // 2
    return pl.pallas_call(
        _proj_qv_kernel,
        out_shape=(jax.ShapeDtypeStruct((n_pad, do_pad), jnp.bfloat16),
                   jax.ShapeDtypeStruct((n_pad, do_pad), jnp.bfloat16)),
        grid_spec=pltpu.PrefetchScalarGridSpec(
            num_scalar_prefetch=0, grid=(n_pad // row_tile,),
            in_specs=[pl.BlockSpec((row_tile, d_in), lambda i: (i, 0)),
                      pl.BlockSpec((d_in, do2), lambda i: (0, 0))],
            out_specs=(pl.BlockSpec((row_tile, do_pad), lambda i: (i, 0)),
                       pl.BlockSpec((row_tile, do_pad), lambda i: (i, 0)))),
        compiler_params=_cparams(("parallel",), vmem),
        cost_estimate=_cost(2 * n_pad * d_in * do2,
                            n_pad * d_in * 4 + d_in * do2 * 2 + 2 * n_pad * do_pad * 2),
    )(x, wqv)


def _agg_hidden(a, z, b, w2, *, row_tile, k_tile, vmem):
    n_pad = a.shape[0]
    dz = z.shape[1]
    d_out = w2.shape[1]
    return pl.pallas_call(
        _agg_hidden_kernel,
        out_shape=jax.ShapeDtypeStruct((n_pad, d_out), jnp.bfloat16),
        grid_spec=pltpu.PrefetchScalarGridSpec(
            num_scalar_prefetch=0,
            grid=(n_pad // row_tile, n_pad // k_tile),
            in_specs=[pl.BlockSpec((row_tile, k_tile), lambda i, k: (i, k)),  # A slab
                      pl.BlockSpec((k_tile, dz), lambda i, k: (k, 0)),        # Z1 slab
                      pl.BlockSpec((1, dz), lambda i, k: (0, 0)),             # b1
                      pl.BlockSpec((dz, d_out), lambda i, k: (0, 0))],        # W2
            out_specs=pl.BlockSpec((row_tile, d_out), lambda i, k: (i, 0)),
            scratch_shapes=[pltpu.VMEM((row_tile, dz), jnp.float32)]),
        compiler_params=_cparams(("parallel", "arbitrary"), vmem),
        cost_estimate=_cost(2 * n_pad * n_pad * dz + 2 * n_pad * dz * d_out,
                            4 * n_pad * n_pad + 2 * n_pad * dz + 2 * n_pad * d_out),
    )(a, z, b, w2)


def _agg_out(a, z, b, *, row_tile, k_tile, vmem):
    n_pad = a.shape[0]
    dz = z.shape[1]
    return pl.pallas_call(
        _agg_out_kernel,
        out_shape=jax.ShapeDtypeStruct((n_pad, dz), jnp.float32),
        grid_spec=pltpu.PrefetchScalarGridSpec(
            num_scalar_prefetch=0,
            grid=(n_pad // row_tile, n_pad // k_tile),
            in_specs=[pl.BlockSpec((row_tile, k_tile), lambda i, k: (i, k)),
                      pl.BlockSpec((k_tile, dz), lambda i, k: (k, 0)),
                      pl.BlockSpec((1, dz), lambda i, k: (0, 0))],
            out_specs=pl.BlockSpec((row_tile, dz), lambda i, k: (i, 0)),
            scratch_shapes=[pltpu.VMEM((row_tile, dz), jnp.float32)]),
        compiler_params=_cparams(("parallel", "arbitrary"), vmem),
        cost_estimate=_cost(2 * n_pad * n_pad * dz,
                            4 * n_pad * n_pad + 2 * n_pad * dz + 4 * n_pad * dz),
    )(a, z, b)


def _cross_attn(q, k, v, *, row_tile, n_valid, vmem):
    n_pad, do_pad = q.shape
    kernel = functools.partial(_attn_kernel, n_valid=n_valid)
    return pl.pallas_call(
        kernel,
        out_shape=jax.ShapeDtypeStruct((n_pad, do_pad), jnp.float32),
        grid_spec=pltpu.PrefetchScalarGridSpec(
            num_scalar_prefetch=0, grid=(n_pad // row_tile,),
            in_specs=[pl.BlockSpec((row_tile, do_pad), lambda i: (i, 0)),   # Q tile
                      pl.BlockSpec((n_pad, do_pad), lambda i: (0, 0)),      # K full
                      pl.BlockSpec((n_pad, do_pad), lambda i: (0, 0))],     # V full
            out_specs=pl.BlockSpec((row_tile, do_pad), lambda i: (i, 0))),
        compiler_params=_cparams(("parallel",), vmem),
        cost_estimate=_cost(4 * n_pad * n_pad * do_pad,
                            3 * n_pad * do_pad * 2 + n_pad * do_pad * 4,
                            transcendentals=n_pad * n_pad),
    )(q, k, v)


def _logits(o1, o2, *, row_tile, mode, vmem):
    n_pad, do_pad = o1.shape
    kernel = functools.partial(_logits_kernel, mode=mode)
    return pl.pallas_call(
        kernel,
        out_shape=jax.ShapeDtypeStruct((n_pad, n_pad), jnp.float32),
        grid_spec=pltpu.PrefetchScalarGridSpec(
            num_scalar_prefetch=0,
            grid=(n_pad // row_tile, n_pad // row_tile),
            in_specs=[pl.BlockSpec((row_tile, do_pad), lambda i, j: (i, 0)),
                      pl.BlockSpec((row_tile, do_pad), lambda i, j: (j, 0)),
                      pl.BlockSpec((row_tile, do_pad), lambda i, j: (i, 0)),
                      pl.BlockSpec((row_tile, do_pad), lambda i, j: (j, 0))],
            out_specs=pl.BlockSpec((row_tile, row_tile), lambda i, j: (i, j))),
        compiler_params=_cparams(("parallel", "parallel"), vmem),
        cost_estimate=_cost(4 * n_pad * n_pad * do_pad,
                            4 * n_pad * do_pad * 4 + n_pad * n_pad * 4),
    )(o1, o1, o2, o2)


# ----------------------------------------------------------------------------
# Glue: GCNConv normalization, parameter init, padding, forward pipeline
# ----------------------------------------------------------------------------
def gcn_norm_adj(edge_index, num_nodes):
    """Dense A_hat = D^{-1/2} (A + I) D^{-1/2} (PyG GCNConv normalization), f32."""
    src, dst = edge_index[0], edge_index[1]
    adj = jnp.zeros((num_nodes, num_nodes), jnp.float32).at[dst, src].add(1.0)
    adj = adj + jnp.eye(num_nodes, dtype=jnp.float32)
    deg = adj.sum(axis=1)
    dinv = jnp.where(deg > 0, 1.0 / jnp.sqrt(deg), 0.0)
    return dinv[:, None] * adj * dinv[None, :]


def make_params(key, input_dim, hidden_dim, output_dim):
    ks = jax.random.split(key, 16)

    def glorot(k, fan_in, fan_out):
        lim = jnp.sqrt(6.0 / (fan_in + fan_out))
        return jax.random.uniform(k, (fan_in, fan_out), jnp.float32, -lim, lim)

    def gcn_branch(k0, k1):
        return {"w1": glorot(k0, input_dim, hidden_dim),
                "b1": jnp.zeros((hidden_dim,), jnp.float32),
                "w2": glorot(k1, hidden_dim, output_dim),
                "b2": jnp.zeros((output_dim,), jnp.float32)}

    std = 1.0 / jnp.sqrt(jnp.float32(output_dim))

    def cross_params(kq, kk, kv):
        u = lambda k: jax.random.uniform(k, (output_dim, output_dim),
                                         jnp.float32, -std, std)
        return {"q": u(kq), "k": u(kk), "v": u(kv)}

    return {"conv1": gcn_branch(ks[0], ks[1]),
            "conv2": gcn_branch(ks[2], ks[3]),
            "cross1": cross_params(ks[4], ks[5], ks[6]),
            "cross2": cross_params(ks[7], ks[8], ks[9])}


def _pad2(a, rows, cols, dtype):
    a = a.astype(dtype)
    return jnp.pad(a, ((0, rows - a.shape[0]), (0, cols - a.shape[1])))


def graph_conflator_forward(params, edge_index1, edge_index2, x_set1, x_set2,
                            logits_mode="cross"):
    n1, d_in = x_set1.shape
    n2 = x_set2.shape[0]
    if n1 != n2:
        raise ValueError("GraphConflator logits require n1 == n2 "
                         f"(got {n1} and {n2})")
    n = n1
    d_hidden = params["conv1"]["w1"].shape[1]
    d_out = params["conv1"]["w2"].shape[1]

    # Lane/sublane-dense padding: node axis AND feature axes -> multiples of 128.
    n_pad = _round_up(n, LANE)
    di = _round_up(d_in, LANE)
    dh = _round_up(d_hidden, LANE)
    do = _round_up(d_out, LANE)

    row_tile = _pick_tile(n_pad)
    k_tile = _pick_tile(n_pad)
    vmem = _vmem_limit_bytes()

    bf16, f32 = jnp.bfloat16, jnp.float32

    # A_hat stays f32 in HBM; the kernels cast each tile to bf16 at the MXU.
    a1 = _pad2(gcn_norm_adj(edge_index1, n), n_pad, n_pad, f32)
    a2 = _pad2(gcn_norm_adj(edge_index2, n), n_pad, n_pad, f32)

    x1 = _pad2(x_set1, n_pad, di, bf16)
    x2 = _pad2(x_set2, n_pad, di, bf16)

    def branch_weights(p):
        return (_pad2(p["w1"], di, dh, bf16),
                jnp.pad(p["b1"].astype(f32), (0, dh - d_hidden)).reshape(1, dh),
                _pad2(p["w2"], dh, do, bf16),
                jnp.pad(p["b2"].astype(f32), (0, do - d_out)).reshape(1, do))

    def gcn_branch(a, x, p):
        w1, b1, w2, b2 = branch_weights(p)
        z1 = _feat(x, w1, row_tile=row_tile, vmem=vmem)            # X @ W1
        z2 = _agg_hidden(a, z1, b1, w2,                            # relu(A z1 + b1) @ W2
                         row_tile=row_tile, k_tile=k_tile, vmem=vmem)
        return _agg_out(a, z2, b2,                                 # A z2 + b2
                        row_tile=row_tile, k_tile=k_tile, vmem=vmem)

    o1 = gcn_branch(a1, x1, params["conv1"])
    o2 = gcn_branch(a2, x2, params["conv2"])

    if logits_mode == "cross":
        def cross(x1_, x2_, p):
            wqv = jnp.concatenate([_pad2(p["q"], do, do, bf16),
                                   _pad2(p["v"], do, do, bf16)], axis=1)
            wk = _pad2(p["k"], do, do, bf16)
            q, v = _proj_qv(x1_, wqv, row_tile=row_tile, vmem=vmem)
            k = _feat(x2_, wk, row_tile=row_tile, vmem=vmem)
            return _cross_attn(q, k, v, row_tile=row_tile, n_valid=n, vmem=vmem)

        o1_new = cross(o1, o2, params["cross1"])   # cross1(out_set1, out_set2)
        o2 = cross(o2, o1_new, params["cross2"])   # cross2 uses *updated* out_set1
        o1 = o1_new

    logits = _logits(o1, o2, row_tile=row_tile, mode=logits_mode, vmem=vmem)
    return logits[:n1, :n2]                        # slice padded rows/cols away


# ----------------------------------------------------------------------------
if __name__ == "__main__":
    INPUT_DIM, HIDDEN_DIM, OUTPUT_DIM = 16, 32, 8
    N = 8  # nodes per graph (N1 == N2 required by the logits sum)

    key = jax.random.PRNGKey(0)
    k_par, k_x1, k_x2 = jax.random.split(key, 3)

    params = make_params(k_par, INPUT_DIM, HIDDEN_DIM, OUTPUT_DIM)

    # Undirected ring graphs (edge_index layout [2, E], src row 0 / dst row 1)
    src = jnp.arange(N, dtype=jnp.int32)
    dst = (src + 1) % N
    edge_index1 = jnp.stack([jnp.concatenate([src, dst]),
                             jnp.concatenate([dst, src])])
    # second graph: ring plus a chord 0<->4
    extra = jnp.array([[0, 4], [4, 0]], dtype=jnp.int32)
    edge_index2 = jnp.concatenate([edge_index1, extra], axis=1)

    x_set1 = jax.random.normal(k_x1, (N, INPUT_DIM), jnp.float32)
    x_set2 = jax.random.normal(k_x2, (N, INPUT_DIM), jnp.float32)

    fwd = jax.jit(functools.partial(graph_conflator_forward,
                                    logits_mode="cross"))
    logits = fwd(params, edge_index1, edge_index2, x_set1, x_set2)
    jax.block_until_ready(logits)

    assert logits.shape == (N, N), logits.shape
    assert bool(jnp.all(jnp.isfinite(logits)))
    print("KERNEL_OK")
</pallas_src>

<mosaic_0001>
module attributes {stable_mosaic.version = 11 : i64} {
  func.func @_feat_kernel(%arg0: i32, %arg1: memref<128x128xbf16, #tpu.memory_space<vmem>>, %arg2: memref<128x128xbf16, #tpu.memory_space<vmem>>, %arg3: memref<128x128xbf16, #tpu.memory_space<vmem>>) attributes {dimension_semantics = [#tpu.dimension_semantics<parallel>], iteration_bounds = array<i64: 1>, scalar_prefetch = 0 : i64, scratch_operands = 0 : i64, tpu.core_type = #tpu.core_type<tc>, window_params = [{transform_indices = @transform_0, window_bounds = array<i64: 128, 128>}, {pipeline_mode = #tpu.pipeline_mode<synchronous>, transform_indices = @transform_1, window_bounds = array<i64: 128, 128>}, {transform_indices = @transform_2, window_bounds = array<i64: 128, 128>}]} {
    %c0 = arith.constant 0 : index
    %c0_0 = arith.constant 0 : index
    %0 = vector.load %arg1[%c0, %c0_0] : memref<128x128xbf16, #tpu.memory_space<vmem>>, vector<128x128xbf16>
    %c0_1 = arith.constant 0 : index
    %c0_2 = arith.constant 0 : index
    %1 = vector.load %arg2[%c0_1, %c0_2] : memref<128x128xbf16, #tpu.memory_space<vmem>>, vector<128x128xbf16>
    %cst = arith.constant dense<0.000000e+00> : vector<128x128xf32>
    %2 = tpu.matmul %0, %1, %cst {dimension_numbers = #tpu.dot_dimension_numbers<[1], [0], [0], [1], [0, 0, 1, 1], [], []>} : vector<128x128xbf16>, vector<128x128xbf16>, vector<128x128xf32> -> vector<128x128xf32>
    %3 = arith.truncf %2 : vector<128x128xf32> to vector<128x128xbf16>
    %c0_3 = arith.constant 0 : index
    %c0_4 = arith.constant 0 : index
    %4 = vector.load %arg3[%c0_3, %c0_4] : memref<128x128xbf16, #tpu.memory_space<vmem>>, vector<128x128xbf16>
    tpu.vector_store %arg3[%c0_3, %c0_4], %3 {strides = array<i32>} : memref<128x128xbf16, #tpu.memory_space<vmem>>, vector<128x128xbf16>,
    return
  }
  func.func @transform_0(%arg0: i32) -> (i32, i32) {
    %c0_i32 = arith.constant 0 : i32
    %c0_i32_0 = arith.constant 0 : i32
    return %arg0, %c0_i32 : i32, i32
  }
  func.func @transform_1(%arg0: i32) -> (i32, i32) {
    %c0_i32 = arith.constant 0 : i32
    %c0_i32_0 = arith.constant 0 : i32
    %c0_i32_1 = arith.constant 0 : i32
    return %c0_i32, %c0_i32_0 : i32, i32
  }
  func.func @transform_2(%arg0: i32) -> (i32, i32) {
    %c0_i32 = arith.constant 0 : i32
    %c0_i32_0 = arith.constant 0 : i32
    return %arg0, %c0_i32 : i32, i32
  }
}

module attributes {stable_mosaic.version = 11 : i64} {
  func.func @_agg_hidden_kernel(%arg0: i32, %arg1: i32, %arg2: memref<128x128xf32, #tpu.memory_space<vmem>>, %arg3: memref<128x128xbf16, #tpu.memory_space<vmem>>, %arg4: memref<1x128xf32, #tpu.memory_space<vmem>>, %arg5: memref<128x128xbf16, #tpu.memory_space<vmem>>, %arg6: memref<128x128xbf16, #tpu.memory_space<vmem>>, %arg7: memref<128x128xf32, #tpu.memory_space<vmem>>) attributes {dimension_semantics = [#tpu.dimension_semantics<parallel>, #tpu.dimension_semantics<arbitrary>], iteration_bounds = array<i64: 1, 1>, scalar_prefetch = 0 : i64, scratch_operands = 1 : i64, tpu.core_type = #tpu.core_type<tc>, window_params = [{transform_indices = @transform_0, window_bounds = array<i64: 128, 128>}, {transform_indices = @transform_1, window_bounds = array<i64: 128, 128>}, {pipeline_mode = #tpu.pipeline_mode<synchronous>, transform_indices = @transform_2, window_bounds = array<i64: 1, 128>}, {pipeline_mode = #tpu.pipeline_mode<synchronous>, transform_indices = @transform_3, window_bounds = array<i64: 128, 128>}, {transform_indices = @transform_4, window_bounds = array<i64: 128, 128>}]} {
    %c0_i32 = arith.constant 0 : i32
    %0 = arith.cmpi eq, %arg1, %c0_i32 : i32
    %1 = arith.extui %0 : i1 to i32
    %c0_i32_0 = arith.constant 0 : i32
    %2 = arith.cmpi ne, %1, %c0_i32_0 : i32
    scf.if %2 {
      %cst_10 = arith.constant 0.000000e+00 : f32
      %13 = vector.broadcast %cst_10 : f32 to vector<128x128xf32>
      %c0_11 = arith.constant 0 : index
      %c0_12 = arith.constant 0 : index
      %14 = vector.load %arg7[%c0_11, %c0_12] : memref<128x128xf32, #tpu.memory_space<vmem>>, vector<128x128xf32>
      tpu.vector_store %arg7[%c0_11, %c0_12], %13 {strides = array<i32>} : memref<128x128xf32, #tpu.memory_space<vmem>>, vector<128x128xf32>,
    } else {
    }
    %c0 = arith.constant 0 : index
    %c0_1 = arith.constant 0 : index
    %3 = vector.load %arg7[%c0, %c0_1] : memref<128x128xf32, #tpu.memory_space<vmem>>, vector<128x128xf32>
    %c0_2 = arith.constant 0 : index
    %c0_3 = arith.constant 0 : index
    %4 = vector.load %arg2[%c0_2, %c0_3] : memref<128x128xf32, #tpu.memory_space<vmem>>, vector<128x128xf32>
    %c0_4 = arith.constant 0 : index
    %c0_5 = arith.constant 0 : index
    %5 = vector.load %arg3[%c0_4, %c0_5] : memref<128x128xbf16, #tpu.memory_space<vmem>>, vector<128x128xbf16>
    %6 = arith.truncf %4 : vector<128x128xf32> to vector<128x128xbf16>
    %cst = arith.constant dense<0.000000e+00> : vector<128x128xf32>
    %7 = tpu.matmul %6, %5, %cst {dimension_numbers = #tpu.dot_dimension_numbers<[1], [0], [0], [1], [0, 0, 1, 1], [], []>} : vector<128x128xbf16>, vector<128x128xbf16>, vector<128x128xf32> -> vector<128x128xf32>
    %8 = arith.addf %3, %7 : vector<128x128xf32>
    %c0_6 = arith.constant 0 : index
    %c0_7 = arith.constant 0 : index
    %9 = vector.load %arg7[%c0_6, %c0_7] : memref<128x128xf32, #tpu.memory_space<vmem>>, vector<128x128xf32>
    tpu.vector_store %arg7[%c0_6, %c0_7], %8 {strides = array<i32>} : memref<128x128xf32, #tpu.memory_space<vmem>>, vector<128x128xf32>,
    %c0_i32_8 = arith.constant 0 : i32
    %10 = arith.cmpi eq, %arg1, %c0_i32_8 : i32
    %11 = arith.extui %10 : i1 to i32
    %c0_i32_9 = arith.constant 0 : i32
    %12 = arith.cmpi ne, %11, %c0_i32_9 : i32
    scf.if %12 {
      %c0_10 = arith.constant 0 : index
      %c0_11 = arith.constant 0 : index
      %13 = vector.load %arg7[%c0_10, %c0_11] : memref<128x128xf32, #tpu.memory_space<vmem>>, vector<128x128xf32>
      %c0_12 = arith.constant 0 : index
      %c0_13 = arith.constant 0 : index
      %14 = vector.load %arg4[%c0_12, %c0_13] : memref<1x128xf32, #tpu.memory_space<vmem>>, vector<1x128xf32>
      %15 = vector.broadcast %14 : vector<1x128xf32> to vector<128x128xf32>
      %16 = arith.addf %13, %15 : vector<128x128xf32>
      %cst_14 = arith.constant 0.000000e+00 : f32
      %17 = vector.broadcast %cst_14 : f32 to vector<128x128xf32>
      %18 = arith.maximumf %16, %17 : vector<128x128xf32>
      %c0_15 = arith.constant 0 : index
      %c0_16 = arith.constant 0 : index
      %19 = vector.load %arg5[%c0_15, %c0_16] : memref<128x128xbf16, #tpu.memory_space<vmem>>, vector<128x128xbf16>
      %20 = arith.truncf %18 : vector<128x128xf32> to vector<128x128xbf16>
      %cst_17 = arith.constant dense<0.000000e+00> : vector<128x128xf32>
      %21 = tpu.matmul %20, %19, %cst_17 {dimension_numbers = #tpu.dot_dimension_numbers<[1], [0], [0], [1], [0, 0, 1, 1], [], []>} : vector<128x128xbf16>, vector<128x128xbf16>, vector<128x128xf32> -> vector<128x128xf32>
      %22 = arith.truncf %21 : vector<128x128xf32> to vector<128x128xbf16>
      %c0_18 = arith.constant 0 : index
      %c0_19 = arith.constant 0 : index
      %23 = vector.load %arg6[%c0_18, %c0_19] : memref<128x128xbf16, #tpu.memory_space<vmem>>, vector<128x128xbf16>
      tpu.vector_store %arg6[%c0_18, %c0_19], %22 {strides = array<i32>} : memref<128x128xbf16, #tpu.memory_space<vmem>>, vector<128x128xbf16>,
    } else {
    }
    return
  }
  func.func @transform_0(%arg0: i32, %arg1: i32) -> (i32, i32) {
    %c0_i32 = arith.constant 0 : i32
    return %arg0, %arg1 : i32, i32
  }
  func.func @transform_1(%arg0: i32, %arg1: i32) -> (i32, i32) {
    %c0_i32 = arith.constant 0 : i32
    %c0_i32_0 = arith.constant 0 : i32
    return %arg1, %c0_i32 : i32, i32
  }
  func.func @transform_2(%arg0: i32, %arg1: i32) -> (i32, i32) {
    %c0_i32 = arith.constant 0 : i32
    %c0_i32_0 = arith.constant 0 : i32
    %c0_i32_1 = arith.constant 0 : i32
    return %c0_i32, %c0_i32_0 : i32, i32
  }
  func.func @transform_3(%arg0: i32, %arg1: i32) -> (i32, i32) {
    %c0_i32 = arith.constant 0 : i32
    %c0_i32_0 = arith.constant 0 : i32
    %c0_i32_1 = arith.constant 0 : i32
    return %c0_i32, %c0_i32_0 : i32, i32
  }
  func.func @transform_4(%arg0: i32, %arg1: i32) -> (i32, i32) {
    %c0_i32 = arith.constant 0 : i32
    %c0_i32_0 = arith.constant 0 : i32
    return %arg0, %c0_i32 : i32, i32
  }
}

module attributes {stable_mosaic.version = 11 : i64} {
  func.func @_agg_out_kernel(%arg0: i32, %arg1: i32, %arg2: memref<128x128xf32, #tpu.memory_space<vmem>>, %arg3: memref<128x128xbf16, #tpu.memory_space<vmem>>, %arg4: memref<1x128xf32, #tpu.memory_space<vmem>>, %arg5: memref<128x128xf32, #tpu.memory_space<vmem>>, %arg6: memref<128x128xf32, #tpu.memory_space<vmem>>) attributes {dimension_semantics = [#tpu.dimension_semantics<parallel>, #tpu.dimension_semantics<arbitrary>], iteration_bounds = array<i64: 1, 1>, scalar_prefetch = 0 : i64, scratch_operands = 1 : i64, tpu.core_type = #tpu.core_type<tc>, window_params = [{transform_indices = @transform_0, window_bounds = array<i64: 128, 128>}, {transform_indices = @transform_1, window_bounds = array<i64: 128, 128>}, {pipeline_mode = #tpu.pipeline_mode<synchronous>, transform_indices = @transform_2, window_bounds = array<i64: 1, 128>}, {transform_indices = @transform_3, window_bounds = array<i64: 128, 128>}]} {
    %c0_i32 = arith.constant 0 : i32
    %0 = arith.cmpi eq, %arg1, %c0_i32 : i32
    %1 = arith.extui %0 : i1 to i32
    %c0_i32_0 = arith.constant 0 : i32
    %2 = arith.cmpi ne, %1, %c0_i32_0 : i32
    scf.if %2 {
      %cst_10 = arith.constant 0.000000e+00 : f32
      %13 = vector.broadcast %cst_10 : f32 to vector<128x128xf32>
      %c0_11 = arith.constant 0 : index
      %c0_12 = arith.constant 0 : index
      %14 = vector.load %arg6[%c0_11, %c0_12] : memref<128x128xf32, #tpu.memory_space<vmem>>, vector<128x128xf32>
      tpu.vector_store %arg6[%c0_11, %c0_12], %13 {strides = array<i32>} : memref<128x128xf32, #tpu.memory_space<vmem>>, vector<128x128xf32>,
    } else {
    }
    %c0 = arith.constant 0 : index
    %c0_1 = arith.constant 0 : index
    %3 = vector.load %arg6[%c0, %c0_1] : memref<128x128xf32, #tpu.memory_space<vmem>>, vector<128x128xf32>
    %c0_2 = arith.constant 0 : index
    %c0_3 = arith.constant 0 : index
    %4 = vector.load %arg2[%c0_2, %c0_3] : memref<128x128xf32, #tpu.memory_space<vmem>>, vector<128x128xf32>
    %c0_4 = arith.constant 0 : index
    %c0_5 = arith.constant 0 : index
    %5 = vector.load %arg3[%c0_4, %c0_5] : memref<128x128xbf16, #tpu.memory_space<vmem>>, vector<128x128xbf16>
    %6 = arith.truncf %4 : vector<128x128xf32> to vector<128x128xbf16>
    %cst = arith.constant dense<0.000000e+00> : vector<128x128xf32>
    %7 = tpu.matmul %6, %5, %cst {dimension_numbers = #tpu.dot_dimension_numbers<[1], [0], [0], [1], [0, 0, 1, 1], [], []>} : vector<128x128xbf16>, vector<128x128xbf16>, vector<128x128xf32> -> vector<128x128xf32>
    %8 = arith.addf %3, %7 : vector<128x128xf32>
    %c0_6 = arith.constant 0 : index
    %c0_7 = arith.constant 0 : index
    %9 = vector.load %arg6[%c0_6, %c0_7] : memref<128x128xf32, #tpu.memory_space<vmem>>, vector<128x128xf32>
    tpu.vector_store %arg6[%c0_6, %c0_7], %8 {strides = array<i32>} : memref<128x128xf32, #tpu.memory_space<vmem>>, vector<128x128xf32>,
    %c0_i32_8 = arith.constant 0 : i32
    %10 = arith.cmpi eq, %arg1, %c0_i32_8 : i32
    %11 = arith.extui %10 : i1 to i32
    %c0_i32_9 = arith.constant 0 : i32
    %12 = arith.cmpi ne, %11, %c0_i32_9 : i32
    scf.if %12 {
      %c0_10 = arith.constant 0 : index
      %c0_11 = arith.constant 0 : index
      %13 = vector.load %arg6[%c0_10, %c0_11] : memref<128x128xf32, #tpu.memory_space<vmem>>, vector<128x128xf32>
      %c0_12 = arith.constant 0 : index
      %c0_13 = arith.constant 0 : index
      %14 = vector.load %arg4[%c0_12, %c0_13] : memref<1x128xf32, #tpu.memory_space<vmem>>, vector<1x128xf32>
      %15 = vector.broadcast %14 : vector<1x128xf32> to vector<128x128xf32>
      %16 = arith.addf %13, %15 : vector<128x128xf32>
      %c0_14 = arith.constant 0 : index
      %c0_15 = arith.constant 0 : index
      %17 = vector.load %arg5[%c0_14, %c0_15] : memref<128x128xf32, #tpu.memory_space<vmem>>, vector<128x128xf32>
      tpu.vector_store %arg5[%c0_14, %c0_15], %16 {strides = array<i32>} : memref<128x128xf32, #tpu.memory_space<vmem>>, vector<128x128xf32>,
    } else {
    }
    return
  }
  func.func @transform_0(%arg0: i32, %arg1: i32) -> (i32, i32) {
    %c0_i32 = arith.constant 0 : i32
    return %arg0, %arg1 : i32, i32
  }
  func.func @transform_1(%arg0: i32, %arg1: i32) -> (i32, i32) {
    %c0_i32 = arith.constant 0 : i32
    %c0_i32_0 = arith.constant 0 : i32
    return %arg1, %c0_i32 : i32, i32
  }
  func.func @transform_2(%arg0: i32, %arg1: i32) -> (i32, i32) {
    %c0_i32 = arith.constant 0 : i32
    %c0_i32_0 = arith.constant 0 : i32
    %c0_i32_1 = arith.constant 0 : i32
    return %c0_i32, %c0_i32_0 : i32, i32
  }
  func.func @transform_3(%arg0: i32, %arg1: i32) -> (i32, i32) {
    %c0_i32 = arith.constant 0 : i32
    %c0_i32_0 = arith.constant 0 : i32
    return %arg0, %c0_i32 : i32, i32
  }
}

module attributes {stable_mosaic.version = 11 : i64} {
  func.func @_proj_qv_kernel(%arg0: i32, %arg1: memref<128x128xf32, #tpu.memory_space<vmem>>, %arg2: memref<128x256xbf16, #tpu.memory_space<vmem>>, %arg3: memref<128x128xbf16, #tpu.memory_space<vmem>>, %arg4: memref<128x128xbf16, #tpu.memory_space<vmem>>) attributes {dimension_semantics = [#tpu.dimension_semantics<parallel>], iteration_bounds = array<i64: 1>, scalar_prefetch = 0 : i64, scratch_operands = 0 : i64, tpu.core_type = #tpu.core_type<tc>, window_params = [{transform_indices = @transform_0, window_bounds = array<i64: 128, 128>}, {pipeline_mode = #tpu.pipeline_mode<synchronous>, transform_indices = @transform_1, window_bounds = array<i64: 128, 256>}, {transform_indices = @transform_2, window_bounds = array<i64: 128, 128>}, {transform_indices = @transform_3, window_bounds = array<i64: 128, 128>}]} {
    %c0 = arith.constant 0 : index
    %c0_0 = arith.constant 0 : index
    %0 = vector.load %arg1[%c0, %c0_0] : memref<128x128xf32, #tpu.memory_space<vmem>>, vector<128x128xf32>
    %c0_1 = arith.constant 0 : index
    %c0_2 = arith.constant 0 : index
    %1 = vector.load %arg2[%c0_1, %c0_2] : memref<128x256xbf16, #tpu.memory_space<vmem>>, vector<128x256xbf16>
    %2 = arith.truncf %0 : vector<128x128xf32> to vector<128x128xbf16>
    %cst = arith.constant dense<0.000000e+00> : vector<128x256xf32>
    %3 = tpu.matmul %2, %1, %cst {dimension_numbers = #tpu.dot_dimension_numbers<[1], [0], [0], [1], [0, 0, 1, 1], [], []>} : vector<128x128xbf16>, vector<128x256xbf16>, vector<128x256xf32> -> vector<128x256xf32>
    %4 = vector.extract_strided_slice %3 {offsets = [0, 0], sizes = [128, 128], strides = [1, 1]} : vector<128x256xf32> to vector<128x128xf32>
    %5 = arith.truncf %4 : vector<128x128xf32> to vector<128x128xbf16>
    %c0_3 = arith.constant 0 : index
    %c0_4 = arith.constant 0 : index
    %6 = vector.load %arg3[%c0_3, %c0_4] : memref<128x128xbf16, #tpu.memory_space<vmem>>, vector<128x128xbf16>
    tpu.vector_store %arg3[%c0_3, %c0_4], %5 {strides = array<i32>} : memref<128x128xbf16, #tpu.memory_space<vmem>>, vector<128x128xbf16>,
    %7 = vector.extract_strided_slice %3 {offsets = [0, 128], sizes = [128, 128], strides = [1, 1]} : vector<128x256xf32> to vector<128x128xf32>
    %8 = arith.truncf %7 : vector<128x128xf32> to vector<128x128xbf16>
    %c0_5 = arith.constant 0 : index
    %c0_6 = arith.constant 0 : index
    %9 = vector.load %arg4[%c0_5, %c0_6] : memref<128x128xbf16, #tpu.memory_space<vmem>>, vector<128x128xbf16>
    tpu.vector_store %arg4[%c0_5, %c0_6], %8 {strides = array<i32>} : memref<128x128xbf16, #tpu.memory_space<vmem>>, vector<128x128xbf16>,
    return
  }
  func.func @transform_0(%arg0: i32) -> (i32, i32) {
    %c0_i32 = arith.constant 0 : i32
    %c0_i32_0 = arith.constant 0 : i32
    return %arg0, %c0_i32 : i32, i32
  }
  func.func @transform_1(%arg0: i32) -> (i32, i32) {
    %c0_i32 = arith.constant 0 : i32
    %c0_i32_0 = arith.constant 0 : i32
    %c0_i32_1 = arith.constant 0 : i32
    return %c0_i32, %c0_i32_0 : i32, i32
  }
  func.func @transform_2(%arg0: i32) -> (i32, i32) {
    %c0_i32 = arith.constant 0 : i32
    %c0_i32_0 = arith.constant 0 : i32
    return %arg0, %c0_i32 : i32, i32
  }
  func.func @transform_3(%arg0: i32) -> (i32, i32) {
    %c0_i32 = arith.constant 0 : i32
    %c0_i32_0 = arith.constant 0 : i32
    return %arg0, %c0_i32 : i32, i32
  }
}

module attributes {stable_mosaic.version = 11 : i64} {
  func.func @_feat_kernel(%arg0: i32, %arg1: memref<128x128xf32, #tpu.memory_space<vmem>>, %arg2: memref<128x128xbf16, #tpu.memory_space<vmem>>, %arg3: memref<128x128xbf16, #tpu.memory_space<vmem>>) attributes {dimension_semantics = [#tpu.dimension_semantics<parallel>], iteration_bounds = array<i64: 1>, scalar_prefetch = 0 : i64, scratch_operands = 0 : i64, tpu.core_type = #tpu.core_type<tc>, window_params = [{transform_indices = @transform_0, window_bounds = array<i64: 128, 128>}, {pipeline_mode = #tpu.pipeline_mode<synchronous>, transform_indices = @transform_1, window_bounds = array<i64: 128, 128>}, {transform_indices = @transform_2, window_bounds = array<i64: 128, 128>}]} {
    %c0 = arith.constant 0 : index
    %c0_0 = arith.constant 0 : index
    %0 = vector.load %arg1[%c0, %c0_0] : memref<128x128xf32, #tpu.memory_space<vmem>>, vector<128x128xf32>
    %c0_1 = arith.constant 0 : index
    %c0_2 = arith.constant 0 : index
    %1 = vector.load %arg2[%c0_1, %c0_2] : memref<128x128xbf16, #tpu.memory_space<vmem>>, vector<128x128xbf16>
    %2 = arith.truncf %0 : vector<128x128xf32> to vector<128x128xbf16>
    %cst = arith.constant dense<0.000000e+00> : vector<128x128xf32>
    %3 = tpu.matmul %2, %1, %cst {dimension_numbers = #tpu.dot_dimension_numbers<[1], [0], [0], [1], [0, 0, 1, 1], [], []>} : vector<128x128xbf16>, vector<128x128xbf16>, vector<128x128xf32> -> vector<128x128xf32>
    %4 = arith.truncf %3 : vector<128x128xf32> to vector<128x128xbf16>
    %c0_3 = arith.constant 0 : index
    %c0_4 = arith.constant 0 : index
    %5 = vector.load %arg3[%c0_3, %c0_4] : memref<128x128xbf16, #tpu.memory_space<vmem>>, vector<128x128xbf16>
    tpu.vector_store %arg3[%c0_3, %c0_4], %4 {strides = array<i32>} : memref<128x128xbf16, #tpu.memory_space<vmem>>, vector<128x128xbf16>,
    return
  }
  func.func @transform_0(%arg0: i32) -> (i32, i32) {
    %c0_i32 = arith.constant 0 : i32
    %c0_i32_0 = arith.constant 0 : i32
    return %arg0, %c0_i32 : i32, i32
  }
  func.func @transform_1(%arg0: i32) -> (i32, i32) {
    %c0_i32 = arith.constant 0 : i32
    %c0_i32_0 = arith.constant 0 : i32
    %c0_i32_1 = arith.constant 0 : i32
    return %c0_i32, %c0_i32_0 : i32, i32
  }
  func.func @transform_2(%arg0: i32) -> (i32, i32) {
    %c0_i32 = arith.constant 0 : i32
    %c0_i32_0 = arith.constant 0 : i32
    return %arg0, %c0_i32 : i32, i32
  }
}

module attributes {stable_mosaic.version = 11 : i64} {
  func.func @_attn_kernel(%arg0: i32, %arg1: memref<128x128xbf16, #tpu.memory_space<vmem>>, %arg2: memref<128x128xbf16, #tpu.memory_space<vmem>>, %arg3: memref<128x128xbf16, #tpu.memory_space<vmem>>, %arg4: memref<128x128xf32, #tpu.memory_space<vmem>>) attributes {dimension_semantics = [#tpu.dimension_semantics<parallel>], iteration_bounds = array<i64: 1>, scalar_prefetch = 0 : i64, scratch_operands = 0 : i64, tpu.core_type = #tpu.core_type<tc>, window_params = [{transform_indices = @transform_0, window_bounds = array<i64: 128, 128>}, {pipeline_mode = #tpu.pipeline_mode<synchronous>, transform_indices = @transform_1, window_bounds = array<i64: 128, 128>}, {pipeline_mode = #tpu.pipeline_mode<synchronous>, transform_indices = @transform_2, window_bounds = array<i64: 128, 128>}, {transform_indices = @transform_3, window_bounds = array<i64: 128, 128>}]} {
    %c0 = arith.constant 0 : index
    %c0_0 = arith.constant 0 : index
    %0 = vector.load %arg1[%c0, %c0_0] : memref<128x128xbf16, #tpu.memory_space<vmem>>, vector<128x128xbf16>
    %c0_1 = arith.constant 0 : index
    %c0_2 = arith.constant 0 : index
    %1 = vector.load %arg2[%c0_1, %c0_2] : memref<128x128xbf16, #tpu.memory_space<vmem>>, vector<128x128xbf16>
    %c0_3 = arith.constant 0 : index
    %c0_4 = arith.constant 0 : index
    %2 = vector.load %arg3[%c0_3, %c0_4] : memref<128x128xbf16, #tpu.memory_space<vmem>>, vector<128x128xbf16>
    %cst = arith.constant dense<0.000000e+00> : vector<128x128xf32>
    %3 = tpu.matmul %0, %1, %cst {dimension_numbers = #tpu.dot_dimension_numbers<[1], [1], [0], [0], [0, 0, 1, 0], [], []>} : vector<128x128xbf16>, vector<128x128xbf16>, vector<128x128xf32> -> vector<128x128xf32>
    %cst_5 = arith.constant 0.00999999977 : f32
    %4 = vector.broadcast %cst_5 : f32 to vector<128x128xf32>
    %5 = arith.mulf %4, %3 : vector<128x128xf32>
    %6 = arith.maximumf %3, %5 : vector<128x128xf32>
    %7 = tpu.iota {dimensions = array<i32: 1>} : vector<128x128xi32>
    %c8_i32 = arith.constant 8 : i32
    %8 = vector.broadcast %c8_i32 : i32 to vector<128x128xi32>
    %9 = arith.cmpi slt, %7, %8 : vector<128x128xi32>
    %cst_6 = arith.constant -1.000000e+30 : f32
    %10 = vector.broadcast %cst_6 : f32 to vector<128x128xf32>
    %11 = arith.select %9, %6, %10 : vector<128x128xi1>, vector<128x128xf32>
    %cst_7 = arith.constant dense<0xFF800000> : vector<128xf32>
    %12 = vector.multi_reduction <maximumf>, %11, %cst_7 [1] : vector<128x128xf32> to vector<128xf32>
    %13 = vector.shape_cast %12 : vector<128xf32> to vector<128x1xf32>
    %14 = vector.broadcast %13 : vector<128x1xf32> to vector<128x128xf32>
    %15 = arith.subf %11, %14 : vector<128x128xf32>
    %16 = math.exp %15 : vector<128x128xf32>
    %cst_8 = arith.constant dense<0.000000e+00> : vector<128xf32>
    %17 = vector.multi_reduction <add>, %16, %cst_8 [1] : vector<128x128xf32> to vector<128xf32>
    %18 = vector.shape_cast %17 : vector<128xf32> to vector<128x1xf32>
    %19 = tpu.reciprocal %18 {approx = true} : vector<128x1xf32> -> vector<128x1xf32>
    %20 = vector.broadcast %19 : vector<128x1xf32> to vector<128x128xf32>
    %21 = arith.mulf %16, %20 : vector<128x128xf32>
    %22 = arith.truncf %21 : vector<128x128xf32> to vector<128x128xbf16>
    %cst_9 = arith.constant dense<0.000000e+00> : vector<128x128xf32>
    %23 = tpu.matmul %22, %2, %cst_9 {dimension_numbers = #tpu.dot_dimension_numbers<[1], [0], [0], [1], [0, 0, 1, 1], [], []>} : vector<128x128xbf16>, vector<128x128xbf16>, vector<128x128xf32> -> vector<128x128xf32>
    %c0_10 = arith.constant 0 : index
    %c0_11 = arith.constant 0 : index
    %24 = vector.load %arg4[%c0_10, %c0_11] : memref<128x128xf32, #tpu.memory_space<vmem>>, vector<128x128xf32>
    tpu.vector_store %arg4[%c0_10, %c0_11], %23 {strides = array<i32>} : memref<128x128xf32, #tpu.memory_space<vmem>>, vector<128x128xf32>,
    return
  }
  func.func @transform_0(%arg0: i32) -> (i32, i32) {
    %c0_i32 = arith.constant 0 : i32
    %c0_i32_0 = arith.constant 0 : i32
    return %arg0, %c0_i32 : i32, i32
  }
  func.func @transform_1(%arg0: i32) -> (i32, i32) {
    %c0_i32 = arith.constant 0 : i32
    %c0_i32_0 = arith.constant 0 : i32
    %c0_i32_1 = arith.constant 0 : i32
    return %c0_i32, %c0_i32_0 : i32, i32
  }
  func.func @transform_2(%arg0: i32) -> (i32, i32) {
    %c0_i32 = arith.constant 0 : i32
    %c0_i32_0 = arith.constant 0 : i32
    %c0_i32_1 = arith.constant 0 : i32
    return %c0_i32, %c0_i32_0 : i32, i32
  }
  func.func @transform_3(%arg0: i32) -> (i32, i32) {
    %c0_i32 = arith.constant 0 : i32
    %c0_i32_0 = arith.constant 0 : i32
    return %arg0, %c0_i32 : i32, i32
  }
}

module attributes {stable_mosaic.version = 11 : i64} {
  func.func @_logits_kernel(%arg0: i32, %arg1: i32, %arg2: memref<128x128xf32, #tpu.memory_space<vmem>>, %arg3: memref<128x128xf32, #tpu.memory_space<vmem>>, %arg4: memref<128x128xf32, #tpu.memory_space<vmem>>, %arg5: memref<128x128xf32, #tpu.memory_space<vmem>>, %arg6: memref<128x128xf32, #tpu.memory_space<vmem>>) attributes {dimension_semantics = [#tpu.dimension_semantics<parallel>, #tpu.dimension_semantics<parallel>], iteration_bounds = array<i64: 1, 1>, scalar_prefetch = 0 : i64, scratch_operands = 0 : i64, tpu.core_type = #tpu.core_type<tc>, window_params = [{transform_indices = @transform_0, window_bounds = array<i64: 128, 128>}, {transform_indices = @transform_1, window_bounds = array<i64: 128, 128>}, {transform_indices = @transform_2, window_bounds = array<i64: 128, 128>}, {transform_indices = @transform_3, window_bounds = array<i64: 128, 128>}, {transform_indices = @transform_4, window_bounds = array<i64: 128, 128>}]} {
    %c0 = arith.constant 0 : index
    %c0_0 = arith.constant 0 : index
    %0 = vector.load %arg2[%c0, %c0_0] : memref<128x128xf32, #tpu.memory_space<vmem>>, vector<128x128xf32>
    %c0_1 = arith.constant 0 : index
    %c0_2 = arith.constant 0 : index
    %1 = vector.load %arg5[%c0_1, %c0_2] : memref<128x128xf32, #tpu.memory_space<vmem>>, vector<128x128xf32>
    %2 = arith.truncf %0 : vector<128x128xf32> to vector<128x128xbf16>
    %3 = arith.truncf %1 : vector<128x128xf32> to vector<128x128xbf16>
    %cst = arith.constant dense<0.000000e+00> : vector<128x128xf32>
    %4 = tpu.matmul %2, %3, %cst {dimension_numbers = #tpu.dot_dimension_numbers<[1], [1], [0], [0], [0, 0, 1, 0], [], []>} : vector<128x128xbf16>, vector<128x128xbf16>, vector<128x128xf32> -> vector<128x128xf32>
    %c0_3 = arith.constant 0 : index
    %c0_4 = arith.constant 0 : index
    %5 = vector.load %arg4[%c0_3, %c0_4] : memref<128x128xf32, #tpu.memory_space<vmem>>, vector<128x128xf32>
    %c0_5 = arith.constant 0 : index
    %c0_6 = arith.constant 0 : index
    %6 = vector.load %arg3[%c0_5, %c0_6] : memref<128x128xf32, #tpu.memory_space<vmem>>, vector<128x128xf32>
    %7 = arith.truncf %5 : vector<128x128xf32> to vector<128x128xbf16>
    %8 = arith.truncf %6 : vector<128x128xf32> to vector<128x128xbf16>
    %cst_7 = arith.constant dense<0.000000e+00> : vector<128x128xf32>
    %9 = tpu.matmul %7, %8, %cst_7 {dimension_numbers = #tpu.dot_dimension_numbers<[1], [1], [0], [0], [0, 0, 1, 0], [], []>} : vector<128x128xbf16>, vector<128x128xbf16>, vector<128x128xf32> -> vector<128x128xf32>
    %10 = arith.addf %4, %9 : vector<128x128xf32>
    %cst_8 = arith.constant 5.000000e-01 : f32
    %11 = vector.broadcast %cst_8 : f32 to vector<128x128xf32>
    %12 = arith.mulf %11, %10 : vector<128x128xf32>
    %c0_9 = arith.constant 0 : index
    %c0_10 = arith.constant 0 : index
    %13 = vector.load %arg6[%c0_9, %c0_10] : memref<128x128xf32, #tpu.memory_space<vmem>>, vector<128x128xf32>
    tpu.vector_store %arg6[%c0_9, %c0_10], %12 {strides = array<i32>} : memref<128x128xf32, #tpu.memory_space<vmem>>, vector<128x128xf32>,
    return
  }
  func.func @transform_0(%arg0: i32, %arg1: i32) -> (i32, i32) {
    %c0_i32 = arith.constant 0 : i32
    %c0_i32_0 = arith.constant 0 : i32
    return %arg0, %c0_i32 : i32, i32
  }
  func.func @transform_1(%arg0: i32, %arg1: i32) -> (i32, i32) {
    %c0_i32 = arith.constant 0 : i32
    %c0_i32_0 = arith.constant 0 : i32
    return %arg1, %c0_i32 : i32, i32
  }
  func.func @transform_2(%arg0: i32, %arg1: i32) -> (i32, i32) {
    %c0_i32 = arith.constant 0 : i32
    %c0_i32_0 = arith.constant 0 : i32
    return %arg0, %c0_i32 : i32, i32
  }
  func.func @transform_3(%arg0: i32, %arg1: i32) -> (i32, i32) {
    %c0_i32 = arith.constant 0 : i32
    %c0_i32_0 = arith.constant 0 : i32
    return %arg1, %c0_i32 : i32, i32
  }
  func.func @transform_4(%arg0: i32, %arg1: i32) -> (i32, i32) {
    %c0_i32 = arith.constant 0 : i32
    return %arg0, %arg1 : i32, i32
  }
}

</mosaic_0001>

<bundles_post_ra>
// kernel: graph_conflator_forward.13
= control target key start
LH: loop header
LB: loop body
LE: loop exit
PB: predicated region body
PF: predicated region fallthrough
CT: control target
= control target key end

     0   :  { %s462_s1 = inlined_call_operand.vmem [shape: bf16[128,128], index: 1, kind: input, shape index: {}]   ;;  %s463_s0 = inlined_call_operand.vmem [shape: bf16[128,128], index: 0, kind: input, shape index: {}]   ;;  %s464_s2 = inlined_call_operand.vmem [shape: bf16[128,128], index: 2, kind: output, shape index: {}]  }
   0x1   :  { %v303_v0 = vld [vmem:[%s462_s1 + $0x38] sm:$0xff]  ;;  %v302_v1 = vld [vmem:[%s462_s1 + $0x30] sm:$0xff]  ;;  %v301_v2 = vld [vmem:[%s462_s1 + $0x28] sm:$0xff] }
   0x2   :  { %139 = vmatpush.bf16.msra.mxu0 %v303_v0  ;;  %351 = vmatpush.bf16.msra.mxu1 %v303_v0  ;;  %v300_v3 = vld [vmem:[%s462_s1 + $0x20] sm:$0xff]  ;;  %v299_v4 = vld [vmem:[%s462_s1 + $0x18] sm:$0xff]  ;;  %v298_v5 = vld [vmem:[%s462_s1 + $0x10] sm:$0xff] }
   0x3   :  { %352 = vmatpush.bf16.msra.mxu2 %v303_v0  ;;  %353 = vmatpush.bf16.msra.mxu3 %v303_v0  ;;  %v297_v6 = vld [vmem:[%s462_s1 + $0x8] sm:$0xff]  ;;  %v296_v7 = vld [vmem:[%s462_s1] sm:$0xff]  ;;  %v290_v9 = vld [vmem:[%s463_s0 + $0x10] sm:$0xff] }
   0x4   :  { %v288_v8 = vld [vmem:[%s463_s0] sm:$0xff]  ;;  %v294_v11 = vld [vmem:[%s463_s0 + $0x30] sm:$0xff]  ;;  %v289_v12 = vld [vmem:[%s463_s0 + $0x8] sm:$0xff] }
   0x5   :  { %v292_v10 = vld [vmem:[%s463_s0 + $0x20] sm:$0xff]  ;;  %v291_v13 = vld [vmem:[%s463_s0 + $0x18] sm:$0xff]  ;;  %v293_v14 = vld [vmem:[%s463_s0 + $0x28] sm:$0xff] }
   0x6   :  { %140 = vmatpush.bf16.msra.mxu0 %v302_v1  ;;  %354 = vmatpush.bf16.msra.mxu1 %v302_v1  ;;  %v295_v15 = vld [vmem:[%s463_s0 + $0x38] sm:$0xff] }
   0x7   :  { %355 = vmatpush.bf16.msra.mxu2 %v302_v1  ;;  %356 = vmatpush.bf16.msra.mxu3 %v302_v1 }
   0xa   :  { %141 = vmatpush.bf16.msra.mxu0 %v301_v2  ;;  %357 = vmatpush.bf16.msra.mxu1 %v301_v2 }
   0xb   :  { %358 = vmatpush.bf16.msra.mxu2 %v301_v2  ;;  %359 = vmatpush.bf16.msra.mxu3 %v301_v2 }
   0xe   :  { %142 = vmatpush.bf16.msra.mxu0 %v300_v3  ;;  %360 = vmatpush.bf16.msra.mxu1 %v300_v3 }
   0xf   :  { %361 = vmatpush.bf16.msra.mxu2 %v300_v3  ;;  %362 = vmatpush.bf16.msra.mxu3 %v300_v3 }
  0x12   :  { %143 = vmatpush.bf16.msra.mxu0 %v299_v4  ;;  %363 = vmatpush.bf16.msra.mxu1 %v299_v4 }
  0x13   :  { %364 = vmatpush.bf16.msra.mxu2 %v299_v4  ;;  %365 = vmatpush.bf16.msra.mxu3 %v299_v4 }
  0x16   :  { %144 = vmatpush.bf16.msra.mxu0 %v298_v5  ;;  %366 = vmatpush.bf16.msra.mxu1 %v298_v5 }
  0x17   :  { %367 = vmatpush.bf16.msra.mxu2 %v298_v5  ;;  %368 = vmatpush.bf16.msra.mxu3 %v298_v5 }
  0x1a   :  { %145 = vmatpush.bf16.msra.mxu0 %v297_v6  ;;  %369 = vmatpush.bf16.msra.mxu1 %v297_v6 }
  0x1b   :  { %370 = vmatpush.bf16.msra.mxu2 %v297_v6  ;;  %371 = vmatpush.bf16.msra.mxu3 %v297_v6 }
  0x1e   :  { %146 = vmatpush.bf16.msra.mxu0 %v296_v7  ;;  %372 = vmatpush.bf16.msra.mxu1 %v296_v7 }
  0x1f   :  { %373 = vmatpush.bf16.msra.mxu2 %v296_v7  ;;  %374 = vmatpush.bf16.msra.mxu3 %v296_v7 }
  0x21   :  { %147 = vmatmul.bf16.vlgmr.msra.gmra.mxu0 %v288_v8  ;;  %157 = vmatmul.bf16.vlgmr.msra.gmra.mxu1 %v290_v9 }
  0x22   :  { %167 = vmatmul.bf16.vlgmr.msra.gmra.mxu2 %v292_v10  ;;  %177 = vmatmul.bf16.vlgmr.msra.gmra.mxu3 %v294_v11 }
  0x31   :  { %152 = vmatmul.bf16.gmra.mxu0 %v289_v12  ;;  %162 = vmatmul.bf16.gmra.mxu1 %v291_v13 }
  0x32   :  { %172 = vmatmul.bf16.gmra.mxu2 %v293_v14  ;;  %182 = vmatmul.bf16.gmra.mxu3 %v295_v15 }
  0x9e   :  { %v148_v16 = vpop.f32.mrf.mxu0  ;;  %v158_v17 = vpop.f32.mrf.mxu1 }
  0xa5   :  { %v168_v18 = vpop.f32.mrf.mxu2  ;;  %v178_v19 = vpop.f32.mrf.mxu3 }
  0xa6   :  { %v150_v20 = vpop.f32.mrf.mxu0  ;;  %v160_v21 = vpop.f32.mrf.mxu1 }
  0xa7   :  { %v307_v22 = vpack.c.bf16 %v150_v20, %v148_v16  ;;  %v317_v23 = vpack.c.bf16 %v160_v21, %v158_v17 }
  0xa9   :  { %308 = vst [vmem:[%s464_s2] sm:$0xff] %v307_v22  }
  0xaa   :  { %345 = vst [vmem:[%s464_s2 + $0x10] sm:$0xff] %v317_v23  }
  0xad   :  { %v170_v24 = vpop.f32.mrf.mxu2  ;;  %v180_v25 = vpop.f32.mrf.mxu3 }
  0xae   :  { %v327_v26 = vpack.c.bf16 %v170_v24, %v168_v18  ;;  %v337_v27 = vpack.c.bf16 %v180_v25, %v178_v19  ;;  %v153_v28 = vpop.f32.mrf.mxu0  ;;  %v163_v29 = vpop.f32.mrf.mxu1 }
  0xb0   :  { %347 = vst [vmem:[%s464_s2 + $0x20] sm:$0xff] %v327_v26  }
  0xb1   :  { %349 = vst [vmem:[%s464_s2 + $0x30] sm:$0xff] %v337_v27  }
  0xb5   :  { %v173_v30 = vpop.f32.mrf.mxu2  ;;  %v183_v31 = vpop.f32.mrf.mxu3 }
  0xb6   :  { %v155_v32 = vpop.f32.mrf.mxu0  ;;  %v165_v33 = vpop.f32.mrf.mxu1 }
  0xb7   :  { %v312_v34 = vpack.c.bf16 %v155_v32, %v153_v28  ;;  %v322_v35 = vpack.c.bf16 %v165_v33, %v163_v29 }
  0xb9   :  { %344 = vst [vmem:[%s464_s2 + $0x8] sm:$0xff] %v312_v34  }
  0xba   :  { %346 = vst [vmem:[%s464_s2 + $0x18] sm:$0xff] %v322_v35  }
  0xbd   :  { %v175_v36 = vpop.f32.mrf.mxu2  ;;  %v185_v37 = vpop.f32.mrf.mxu3 }
  0xbe   :  { %v332_v38 = vpack.c.bf16 %v175_v36, %v173_v30  ;;  %v342_v39 = vpack.c.bf16 %v185_v37, %v183_v31 }
  0xc0   :  { %348 = vst [vmem:[%s464_s2 + $0x28] sm:$0xff] %v332_v38  }
  0xc1   :  { %350 = vst [vmem:[%s464_s2 + $0x38] sm:$0xff] %v342_v39  }

// kernel: graph_conflator_forward.15
= control target key start
LH: loop header
LB: loop body
LE: loop exit
PB: predicated region body
PF: predicated region fallthrough
CT: control target
= control target key end

     0   :  { %s486_s1 = inlined_call_operand.vmem [shape: bf16[128,128], index: 1, kind: input, shape index: {}]   ;;  %s487_s2 = inlined_call_operand.vmem [shape: f32[1,128], index: 2, kind: input, shape index: {}]   ;;  %s488_s0 = inlined_call_operand.vmem [shape: f32[128,128], index: 0, kind: input, shape index: {}]   ;;  %s489_s3 = inlined_call_operand.vmem [shape: f32[128,128], index: 3, kind: output, shape index: {}]  }
   0x1   :  { %v317_v0 = vld [vmem:[%s486_s1 + $0x38] sm:$0xff]  ;;  %v316_v1 = vld [vmem:[%s486_s1 + $0x30] sm:$0xff]  ;;  %v315_v2 = vld [vmem:[%s486_s1 + $0x28] sm:$0xff] }
   0x2   :  { %138 = vmatpush.bf16.msra.mxu0 %v317_v0  ;;  %318 = vmatpush.bf16.msra.mxu1 %v317_v0  ;;  %v314_v3 = vld [vmem:[%s486_s1 + $0x20] sm:$0xff]  ;;  %v313_v4 = vld [vmem:[%s486_s1 + $0x18] sm:$0xff]  ;;  %v312_v5 = vld [vmem:[%s486_s1 + $0x10] sm:$0xff] }
   0x3   :  { %319 = vmatpush.bf16.msra.mxu2 %v317_v0  ;;  %320 = vmatpush.bf16.msra.mxu3 %v317_v0  ;;  %v311_v6 = vld [vmem:[%s486_s1 + $0x8] sm:$0xff]  ;;  %v310_v7 = vld [vmem:[%s486_s1] sm:$0xff]  ;;  %v52_v20 = vld [vmem:[%s488_s0 + $0x10] sm:$0xff] }
   0x4   :  { %v50_v8 = vld [vmem:[%s488_s0] sm:$0xff]  ;;  %v51_v9 = vld [vmem:[%s488_s0 + $0x8] sm:$0xff]  ;;  %v53_v21 = vld [vmem:[%s488_s0 + $0x18] sm:$0xff] }
   0x5   :  { %v54_v10 = vld [vmem:[%s488_s0 + $0x20] sm:$0xff]  ;;  %v55_v11 = vld [vmem:[%s488_s0 + $0x28] sm:$0xff]  ;;  %v82_v16 = vpack.c.bf16 %v51_v9, %v50_v8  ;;  %v56_v22 = vld [vmem:[%s488_s0 + $0x30] sm:$0xff]  ;;  %v83_v28 = vpack.c.bf16 %v53_v21, %v52_v20 }
   0x6   :  { %139 = vmatpush.bf16.msra.mxu0 %v316_v1  ;;  %321 = vmatpush.bf16.msra.mxu1 %v316_v1  ;;  %v58_v12 = vld [vmem:[%s488_s0 + $0x40] sm:$0xff]  ;;  %v59_v13 = vld [vmem:[%s488_s0 + $0x48] sm:$0xff]  ;;  %v84_v17 = vpack.c.bf16 %v55_v11, %v54_v10  ;;  %v57_v23 = vld [vmem:[%s488_s0 + $0x38] sm:$0xff] }
   0x7   :  { %322 = vmatpush.bf16.msra.mxu2 %v316_v1  ;;  %323 = vmatpush.bf16.msra.mxu3 %v316_v1  ;;  %v62_v14 = vld [vmem:[%s488_s0 + $0x60] sm:$0xff]  ;;  %v63_v15 = vld [vmem:[%s488_s0 + $0x68] sm:$0xff]  ;;  %v86_v18 = vpack.c.bf16 %v59_v13, %v58_v12  ;;  %v60_v24 = vld [vmem:[%s488_s0 + $0x50] sm:$0xff]  ;;  %v85_v29 = vpack.c.bf16 %v57_v23, %v56_v22 }
   0x8   :  { %v88_v19 = vpack.c.bf16 %v63_v15, %v62_v14  ;;  %v61_v25 = vld [vmem:[%s488_s0 + $0x58] sm:$0xff]  ;;  %v64_v26 = vld [vmem:[%s488_s0 + $0x70] sm:$0xff]  ;;  %v342_v32 = vld [vmem:[%s487_s2] ss:$0 sm:$0xff] }
   0x9   :  { %v65_v27 = vld [vmem:[%s488_s0 + $0x78] sm:$0xff]  ;;  %v87_v30 = vpack.c.bf16 %v61_v25, %v60_v24 }
   0xa   :  { %140 = vmatpush.bf16.msra.mxu0 %v315_v2  ;;  %324 = vmatpush.bf16.msra.mxu1 %v315_v2  ;;  %v89_v31 = vpack.c.bf16 %v65_v27, %v64_v26 }
   0xb   :  { %325 = vmatpush.bf16.msra.mxu2 %v315_v2  ;;  %326 = vmatpush.bf16.msra.mxu3 %v315_v2 }
   0xe   :  { %141 = vmatpush.bf16.msra.mxu0 %v314_v3  ;;  %327 = vmatpush.bf16.msra.mxu1 %v314_v3 }
   0xf   :  { %328 = vmatpush.bf16.msra.mxu2 %v314_v3  ;;  %329 = vmatpush.bf16.msra.mxu3 %v314_v3 }
  0x12   :  { %142 = vmatpush.bf16.msra.mxu0 %v313_v4  ;;  %330 = vmatpush.bf16.msra.mxu1 %v313_v4 }
  0x13   :  { %331 = vmatpush.bf16.msra.mxu2 %v313_v4  ;;  %332 = vmatpush.bf16.msra.mxu3 %v313_v4 }
  0x16   :  { %143 = vmatpush.bf16.msra.mxu0 %v312_v5  ;;  %333 = vmatpush.bf16.msra.mxu1 %v312_v5 }
  0x17   :  { %334 = vmatpush.bf16.msra.mxu2 %v312_v5  ;;  %335 = vmatpush.bf16.msra.mxu3 %v312_v5 }
  0x1a   :  { %144 = vmatpush.bf16.msra.mxu0 %v311_v6  ;;  %336 = vmatpush.bf16.msra.mxu1 %v311_v6 }
  0x1b   :  { %337 = vmatpush.bf16.msra.mxu2 %v311_v6  ;;  %338 = vmatpush.bf16.msra.mxu3 %v311_v6 }
  0x1e   :  { %145 = vmatpush.bf16.msra.mxu0 %v310_v7  ;;  %339 = vmatpush.bf16.msra.mxu1 %v310_v7 }
  0x1f   :  { %340 = vmatpush.bf16.msra.mxu2 %v310_v7  ;;  %341 = vmatpush.bf16.msra.mxu3 %v310_v7 }
  0x21   :  { %146 = vmatmul.bf16.vlgmr.msra.gmra.mxu0 %v82_v16  ;;  %156 = vmatmul.bf16.vlgmr.msra.gmra.mxu1 %v84_v17 }
  0x22   :  { %166 = vmatmul.bf16.vlgmr.msra.gmra.mxu2 %v86_v18  ;;  %176 = vmatmul.bf16.vlgmr.msra.gmra.mxu3 %v88_v19 }
  0x31   :  { %151 = vmatmul.bf16.gmra.mxu0 %v83_v28  ;;  %161 = vmatmul.bf16.gmra.mxu1 %v85_v29 }
  0x32   :  { %171 = vmatmul.bf16.gmra.mxu2 %v87_v30  ;;  %181 = vmatmul.bf16.gmra.mxu3 %v89_v31 }
  0x9e   :  { %v147_v33 = vpop.f32.mrf.mxu0  ;;  %v157_v34 = vpop.f32.mrf.mxu1 }
  0x9f   :  { %v242_v35 = vadd.f32 %v342_v32, %v147_v33  ;;  %v246_v36 = vadd.f32 %v342_v32, %v157_v34 }
  0xa1   :  { %258 = vst [vmem:[%s489_s3] sm:$0xff] %v242_v35 }
  0xa2   :  { %262 = vst [vmem:[%s489_s3 + $0x20] sm:$0xff] %v246_v36 }
  0xa5   :  { %v167_v37 = vpop.f32.mrf.mxu2  ;;  %v177_v38 = vpop.f32.mrf.mxu3 }
  0xa6   :  { %v250_v39 = vadd.f32 %v342_v32, %v167_v37  ;;  %v254_v40 = vadd.f32 %v342_v32, %v177_v38  ;;  %v149_v41 = vpop.f32.mrf.mxu0  ;;  %v159_v42 = vpop.f32.mrf.mxu1 }
  0xa7   :  { %v243_v43 = vadd.f32 %v342_v32, %v149_v41  ;;  %v247_v44 = vadd.f32 %v342_v32, %v159_v42 }
  0xa8   :  { %266 = vst [vmem:[%s489_s3 + $0x40] sm:$0xff] %v250_v39 }
  0xa9   :  { %270 = vst [vmem:[%s489_s3 + $0x60] sm:$0xff] %v254_v40 }
  0xaa   :  { %259 = vst [vmem:[%s489_s3 + $0x8] sm:$0xff] %v243_v43 }
  0xab   :  { %263 = vst [vmem:[%s489_s3 + $0x28] sm:$0xff] %v247_v44 }
  0xad   :  { %v169_v45 = vpop.f32.mrf.mxu2  ;;  %v179_v46 = vpop.f32.mrf.mxu3 }
  0xae   :  { %v251_v47 = vadd.f32 %v342_v32, %v169_v45  ;;  %v255_v48 = vadd.f32 %v342_v32, %v179_v46  ;;  %v152_v49 = vpop.f32.mrf.mxu0  ;;  %v162_v50 = vpop.f32.mrf.mxu1 }
  0xaf   :  { %v244_v51 = vadd.f32 %v342_v32, %v152_v49  ;;  %v248_v52 = vadd.f32 %v342_v32, %v162_v50 }
  0xb0   :  { %267 = vst [vmem:[%s489_s3 + $0x48] sm:$0xff] %v251_v47 }
  0xb1   :  { %271 = vst [vmem:[%s489_s3 + $0x68] sm:$0xff] %v255_v48 }
  0xb2   :  { %260 = vst [vmem:[%s489_s3 + $0x10] sm:$0xff] %v244_v51 }
  0xb3   :  { %264 = vst [vmem:[%s489_s3 + $0x30] sm:$0xff] %v248_v52 }
  0xb5   :  { %v172_v53 = vpop.f32.mrf.mxu2  ;;  %v182_v54 = vpop.f32.mrf.mxu3 }
  0xb6   :  { %v252_v55 = vadd.f32 %v342_v32, %v172_v53  ;;  %v256_v56 = vadd.f32 %v342_v32, %v182_v54  ;;  %v154_v57 = vpop.f32.mrf.mxu0  ;;  %v164_v58 = vpop.f32.mrf.mxu1 }
  0xb7   :  { %v245_v59 = vadd.f32 %v342_v32, %v154_v57  ;;  %v249_v60 = vadd.f32 %v342_v32, %v164_v58 }
  0xb8   :  { %268 = vst [vmem:[%s489_s3 + $0x50] sm:$0xff] %v252_v55 }
  0xb9   :  { %272 = vst [vmem:[%s489_s3 + $0x70] sm:$0xff] %v256_v56 }
  0xba   :  { %261 = vst [vmem:[%s489_s3 + $0x18] sm:$0xff] %v245_v59 }
  0xbb   :  { %265 = vst [vmem:[%s489_s3 + $0x38] sm:$0xff] %v249_v60 }
  0xbd   :  { %v174_v61 = vpop.f32.mrf.mxu2  ;;  %v184_v62 = vpop.f32.mrf.mxu3 }
  0xbe   :  { %v253_v63 = vadd.f32 %v342_v32, %v174_v61  ;;  %v257_v0 = vadd.f32 %v342_v32, %v184_v62 }
  0xc0   :  { %269 = vst [vmem:[%s489_s3 + $0x58] sm:$0xff] %v253_v63 }
  0xc1   :  { %273 = vst [vmem:[%s489_s3 + $0x78] sm:$0xff] %v257_v0 }

// kernel: graph_conflator_forward.14
= control target key start
LH: loop header
LB: loop body
LE: loop exit
PB: predicated region body
PF: predicated region fallthrough
CT: control target
= control target key end

     0   :  { %s726_s1 = inlined_call_operand.vmem [shape: bf16[128,128], index: 1, kind: input, shape index: {}]   ;;  %s727_s2 = inlined_call_operand.vmem [shape: f32[1,128], index: 2, kind: input, shape index: {}]   ;;  %s728_s0 = inlined_call_operand.vmem [shape: f32[128,128], index: 0, kind: input, shape index: {}]   ;;  %s729_s3 = inlined_call_operand.vmem [shape: bf16[128,128], index: 3, kind: input, shape index: {}]   ;;  %s730_s4 = inlined_call_operand.vmem [shape: bf16[128,128], index: 4, kind: output, shape index: {}]  }
   0x1   :  { %v505_v0 = vld [vmem:[%s726_s1 + $0x38] sm:$0xff]  ;;  %v504_v1 = vld [vmem:[%s726_s1 + $0x30] sm:$0xff]  ;;  %v503_v2 = vld [vmem:[%s726_s1 + $0x28] sm:$0xff] }
   0x2   :  { %141 = vmatpush.bf16.msra.mxu0 %v505_v0  ;;  %561 = vmatpush.bf16.msra.mxu2 %v505_v0  ;;  %v502_v3 = vld [vmem:[%s726_s1 + $0x20] sm:$0xff]  ;;  %v501_v4 = vld [vmem:[%s726_s1 + $0x18] sm:$0xff]  ;;  %v500_v5 = vld [vmem:[%s726_s1 + $0x10] sm:$0xff] }
   0x3   :  { %v499_v6 = vld [vmem:[%s726_s1 + $0x8] sm:$0xff]  ;;  %v498_v7 = vld [vmem:[%s726_s1] sm:$0xff]  ;;  %v55_v14 = vld [vmem:[%s728_s0 + $0x10] sm:$0xff] }
   0x4   :  { %v53_v8 = vld [vmem:[%s728_s0] sm:$0xff]  ;;  %v54_v9 = vld [vmem:[%s728_s0 + $0x8] sm:$0xff]  ;;  %v56_v15 = vld [vmem:[%s728_s0 + $0x18] sm:$0xff] }
   0x5   :  { %v61_v10 = vld [vmem:[%s728_s0 + $0x40] sm:$0xff]  ;;  %v62_v11 = vld [vmem:[%s728_s0 + $0x48] sm:$0xff]  ;;  %v85_v12 = vpack.c.bf16 %v54_v9, %v53_v8  ;;  %v63_v16 = vld [vmem:[%s728_s0 + $0x50] sm:$0xff]  ;;  %v86_v18 = vpack.c.bf16 %v56_v15, %v55_v14 }
   0x6   :  { %142 = vmatpush.bf16.msra.mxu0 %v504_v1  ;;  %562 = vmatpush.bf16.msra.mxu2 %v504_v1  ;;  %v89_v13 = vpack.c.bf16 %v62_v11, %v61_v10  ;;  %v64_v17 = vld [vmem:[%s728_s0 + $0x58] sm:$0xff]  ;;  %v512_v21 = vld [vmem:[%s729_s3 + $0x30] sm:$0xff]  ;;  %v511_v22 = vld [vmem:[%s729_s3 + $0x28] sm:$0xff] }
   0x7   :  { %v90_v19 = vpack.c.bf16 %v64_v17, %v63_v16  ;;  %v513_v20 = vld [vmem:[%s729_s3 + $0x38] sm:$0xff]  ;;  %v57_v23 = vld [vmem:[%s728_s0 + $0x20] sm:$0xff]  ;;  %v58_v24 = vld [vmem:[%s728_s0 + $0x28] sm:$0xff] }
   0x8   :  { %349 = vmatpush.bf16.msra.mxu1 %v513_v20  ;;  %569 = vmatpush.bf16.msra.mxu3 %v513_v20  ;;  %v65_v25 = vld [vmem:[%s728_s0 + $0x60] sm:$0xff]  ;;  %v66_v26 = vld [vmem:[%s728_s0 + $0x68] sm:$0xff]  ;;  %v87_v28 = vpack.c.bf16 %v58_v24, %v57_v23  ;;  %v59_v30 = vld [vmem:[%s728_s0 + $0x30] sm:$0xff] }
   0x9   :  { %v510_v27 = vld [vmem:[%s729_s3 + $0x20] sm:$0xff]  ;;  %v91_v29 = vpack.c.bf16 %v66_v26, %v65_v25  ;;  %v60_v31 = vld [vmem:[%s728_s0 + $0x38] sm:$0xff]  ;;  %v67_v32 = vld [vmem:[%s728_s0 + $0x70] sm:$0xff] }
   0xa   :  { %143 = vmatpush.bf16.msra.mxu0 %v503_v2  ;;  %563 = vmatpush.bf16.msra.mxu2 %v503_v2  ;;  %v68_v33 = vld [vmem:[%s728_s0 + $0x78] sm:$0xff]  ;;  %v88_v34 = vpack.c.bf16 %v60_v31, %v59_v30  ;;  %v508_v37 = vld [vmem:[%s729_s3 + $0x10] sm:$0xff]  ;;  %v507_v38 = vld [vmem:[%s729_s3 + $0x8] sm:$0xff] }
   0xb   :  { %v92_v35 = vpack.c.bf16 %v68_v33, %v67_v32  ;;  %v509_v36 = vld [vmem:[%s729_s3 + $0x18] sm:$0xff]  ;;  %v506_v39 = vld [vmem:[%s729_s3] sm:$0xff] }
   0xc   :  { %350 = vmatpush.bf16.msra.mxu1 %v512_v21  ;;  %570 = vmatpush.bf16.msra.mxu3 %v512_v21  ;;  %v577_v41 = vld [vmem:[%s727_s2] ss:$0 sm:$0xff] }
   0xe   :  { %144 = vmatpush.bf16.msra.mxu0 %v502_v3  ;;  %564 = vmatpush.bf16.msra.mxu2 %v502_v3 }
  0x10   :  { %351 = vmatpush.bf16.msra.mxu1 %v511_v22  ;;  %571 = vmatpush.bf16.msra.mxu3 %v511_v22 }
  0x12   :  { %145 = vmatpush.bf16.msra.mxu0 %v501_v4  ;;  %565 = vmatpush.bf16.msra.mxu2 %v501_v4 }
  0x14   :  { %352 = vmatpush.bf16.msra.mxu1 %v510_v27  ;;  %572 = vmatpush.bf16.msra.mxu3 %v510_v27 }
  0x16   :  { %146 = vmatpush.bf16.msra.mxu0 %v500_v5  ;;  %566 = vmatpush.bf16.msra.mxu2 %v500_v5 }
  0x18   :  { %353 = vmatpush.bf16.msra.mxu1 %v509_v36  ;;  %573 = vmatpush.bf16.msra.mxu3 %v509_v36 }
  0x1a   :  { %147 = vmatpush.bf16.msra.mxu0 %v499_v6  ;;  %567 = vmatpush.bf16.msra.mxu2 %v499_v6 }
  0x1c   :  { %354 = vmatpush.bf16.msra.mxu1 %v508_v37  ;;  %574 = vmatpush.bf16.msra.mxu3 %v508_v37 }
  0x1e   :  { %148 = vmatpush.bf16.msra.mxu0 %v498_v7  ;;  %568 = vmatpush.bf16.msra.mxu2 %v498_v7 }
  0x20   :  { %355 = vmatpush.bf16.msra.mxu1 %v507_v38  ;;  %575 = vmatpush.bf16.msra.mxu3 %v507_v38 }
  0x21   :  { %149 = vmatmul.bf16.vlgmr.msra.gmra.mxu0 %v85_v12  ;;  %169 = vmatmul.bf16.vlgmr.msra.gmra.mxu2 %v89_v13 }
  0x24   :  { %356 = vmatpush.bf16.msra.mxu1 %v506_v39  ;;  %576 = vmatpush.bf16.msra.mxu3 %v506_v39 }
  0x31   :  { %154 = vmatmul.bf16.gmra.mxu0 %v86_v18  ;;  %174 = vmatmul.bf16.gmra.mxu2 %v90_v19 }
  0x41   :  { %159 = vmatmul.bf16.gmra.mxu0 %v87_v28  ;;  %179 = vmatmul.bf16.gmra.mxu2 %v91_v29 }
  0x51   :  { %164 = vmatmul.bf16.gmra.mxu0 %v88_v34  ;;  %184 = vmatmul.bf16.gmra.mxu2 %v92_v35 }
  0x9e   :  { %v150_v40 = vpop.f32.mrf.mxu0 }
  0x9f   :  { %v245_v42 = vadd.f32 %v577_v41, %v150_v40 }
  0xa1   :  { %v261_v45 = vmax.f32 %v245_v42, 0.0 }
  0xa4   :  { %v170_v43 = vpop.f32.mrf.mxu2 }
  0xa5   :  { %v253_v48 = vadd.f32 %v577_v41, %v170_v43 }
  0xa6   :  { %v152_v44 = vpop.f32.mrf.mxu0 }
  0xa7   :  { %v246_v46 = vadd.f32 %v577_v41, %v152_v44  ;;  %v269_v53 = vmax.f32 %v253_v48, 0.0 }
  0xa9   :  { %v262_v47 = vmax.f32 %v246_v46, 0.0 }
  0xab   :  { %v293_v49 = vpack.c.bf16 %v262_v47, %v261_v45 }
  0xac   :  { %v172_v50 = vpop.f32.mrf.mxu2 }
  0xad   :  { %v254_v51 = vadd.f32 %v577_v41, %v172_v50  ;;  %357 = vmatmul.bf16.vlgmr.msra.gmra.mxu1 %v293_v49 }
  0xae   :  { %v155_v52 = vpop.f32.mrf.mxu0 }
  0xaf   :  { %v270_v54 = vmax.f32 %v254_v51, 0.0  ;;  %v247_v56 = vadd.f32 %v577_v41, %v155_v52 }
  0xb1   :  { %v297_v55 = vpack.c.bf16 %v270_v54, %v269_v53  ;;  %v263_v59 = vmax.f32 %v247_v56, 0.0 }
  0xb3   :  { %377 = vmatmul.bf16.vlgmr.msra.gmra.mxu3 %v297_v55 }
  0xb4   :  { %v175_v57 = vpop.f32.mrf.mxu2 }
  0xb5   :  { %v255_v62 = vadd.f32 %v577_v41, %v175_v57 }
  0xb6   :  { %v157_v58 = vpop.f32.mrf.mxu0 }
  0xb7   :  { %v248_v60 = vadd.f32 %v577_v41, %v157_v58  ;;  %v271_v3 = vmax.f32 %v255_v62, 0.0 }
  0xb9   :  { %v264_v61 = vmax.f32 %v248_v60, 0.0 }
  0xbb   :  { %v294_v63 = vpack.c.bf16 %v264_v61, %v263_v59 }
  0xbc   :  { %v177_v0 = vpop.f32.mrf.mxu2 }
  0xbd   :  { %v256_v1 = vadd.f32 %v577_v41, %v177_v0  ;;  %362 = vmatmul.bf16.gmra.mxu1 %v294_v63 }
  0xbe   :  { %v160_v2 = vpop.f32.mrf.mxu0 }
  0xbf   :  { %v272_v4 = vmax.f32 %v256_v1, 0.0  ;;  %v249_v6 = vadd.f32 %v577_v41, %v160_v2 }
  0xc1   :  { %v298_v5 = vpack.c.bf16 %v272_v4, %v271_v3  ;;  %v265_v9 = vmax.f32 %v249_v6, 0.0 }
  0xc3   :  { %382 = vmatmul.bf16.gmra.mxu3 %v298_v5 }
  0xc4   :  { %v180_v7 = vpop.f32.mrf.mxu2 }
  0xc5   :  { %v257_v12 = vadd.f32 %v577_v41, %v180_v7 }
  0xc6   :  { %v162_v8 = vpop.f32.mrf.mxu0 }
  0xc7   :  { %v250_v10 = vadd.f32 %v577_v41, %v162_v8  ;;  %v273_v17 = vmax.f32 %v257_v12, 0.0 }
  0xc9   :  { %v266_v11 = vmax.f32 %v250_v10, 0.0 }
  0xcb   :  { %v295_v13 = vpack.c.bf16 %v266_v11, %v265_v9 }
  0xcc   :  { %v182_v14 = vpop.f32.mrf.mxu2 }
  0xcd   :  { %v258_v15 = vadd.f32 %v577_v41, %v182_v14  ;;  %367 = vmatmul.bf16.gmra.mxu1 %v295_v13 }
  0xce   :  { %v165_v16 = vpop.f32.mrf.mxu0 }
  0xcf   :  { %v274_v18 = vmax.f32 %v258_v15, 0.0  ;;  %v251_v20 = vadd.f32 %v577_v41, %v165_v16 }
  0xd1   :  { %v299_v19 = vpack.c.bf16 %v274_v18, %v273_v17  ;;  %v267_v23 = vmax.f32 %v251_v20, 0.0 }
  0xd3   :  { %387 = vmatmul.bf16.gmra.mxu3 %v299_v19 }
  0xd4   :  { %v185_v21 = vpop.f32.mrf.mxu2 }
  0xd5   :  { %v259_v26 = vadd.f32 %v577_v41, %v185_v21 }
  0xd6   :  { %v167_v22 = vpop.f32.mrf.mxu0 }
  0xd7   :  { %v252_v24 = vadd.f32 %v577_v41, %v167_v22  ;;  %v275_v30 = vmax.f32 %v259_v26, 0.0 }
  0xd9   :  { %v268_v25 = vmax.f32 %v252_v24, 0.0 }
  0xdb   :  { %v296_v27 = vpack.c.bf16 %v268_v25, %v267_v23 }
  0xdc   :  { %v187_v28 = vpop.f32.mrf.mxu2 }
  0xdd   :  { %v260_v29 = vadd.f32 %v577_v41, %v187_v28  ;;  %372 = vmatmul.bf16.gmra.mxu1 %v296_v27 }
  0xdf   :  { %v276_v31 = vmax.f32 %v260_v29, 0.0 }
  0xe1   :  { %v300_v32 = vpack.c.bf16 %v276_v31, %v275_v30 }
  0xe3   :  { %392 = vmatmul.bf16.gmra.mxu3 %v300_v32 }
 0x12a   :  { %v358_v33 = vpop.f32.mrf.mxu1 }
 0x132   :  { %v360_v34 = vpop.f32.mrf.mxu1 }
 0x133   :  { %v517_v35 = vpack.c.bf16 %v360_v34, %v358_v33 }
 0x135   :  { %518 = vst [vmem:[%s730_s4] sm:$0xff] %v517_v35  }
 0x136   :  { %v378_v36 = vpop.f32.mrf.mxu3 }
 0x13a   :  { %v363_v37 = vpop.f32.mrf.mxu1 }
 0x13e   :  { %v380_v38 = vpop.f32.mrf.mxu3 }
 0x13f   :  { %v537_v39 = vpack.c.bf16 %v380_v38, %v378_v36 }
 0x141   :  { %557 = vst [vmem:[%s730_s4 + $0x20] sm:$0xff] %v537_v39  }
 0x142   :  { %v365_v40 = vpop.f32.mrf.mxu1 }
 0x143   :  { %v522_v41 = vpack.c.bf16 %v365_v40, %v363_v37 }
 0x145   :  { %554 = vst [vmem:[%s730_s4 + $0x8] sm:$0xff] %v522_v41  }
 0x146   :  { %v383_v42 = vpop.f32.mrf.mxu3 }
 0x14a   :  { %v368_v43 = vpop.f32.mrf.mxu1 }
 0x14e   :  { %v385_v44 = vpop.f32.mrf.mxu3 }
 0x14f   :  { %v542_v45 = vpack.c.bf16 %v385_v44, %v383_v42 }
 0x151   :  { %558 = vst [vmem:[%s730_s4 + $0x28] sm:$0xff] %v542_v45  }
 0x152   :  { %v370_v46 = vpop.f32.mrf.mxu1 }
 0x153   :  { %v527_v47 = vpack.c.bf16 %v370_v46, %v368_v43 }
 0x155   :  { %555 = vst [vmem:[%s730_s4 + $0x10] sm:$0xff] %v527_v47  }
 0x156   :  { %v388_v48 = vpop.f32.mrf.mxu3 }
 0x15a   :  { %v373_v49 = vpop.f32.mrf.mxu1 }
 0x15e   :  { %v390_v50 = vpop.f32.mrf.mxu3 }
 0x15f   :  { %v547_v51 = vpack.c.bf16 %v390_v50, %v388_v48 }
 0x161   :  { %559 = vst [vmem:[%s730_s4 + $0x30] sm:$0xff] %v547_v51  }
 0x162   :  { %v375_v52 = vpop.f32.mrf.mxu1 }
 0x163   :  { %v532_v53 = vpack.c.bf16 %v375_v52, %v373_v49 }
 0x165   :  { %556 = vst [vmem:[%s730_s4 + $0x18] sm:$0xff] %v532_v53  }
 0x166   :  { %v393_v54 = vpop.f32.mrf.mxu3 }
 0x16e   :  { %v395_v55 = vpop.f32.mrf.mxu3 }
 0x16f   :  { %v552_v56 = vpack.c.bf16 %v395_v55, %v393_v54 }
 0x171   :  { %560 = vst [vmem:[%s730_s4 + $0x38] sm:$0xff] %v552_v56  }

// kernel: graph_conflator_forward.20
= control target key start
LH: loop header
LB: loop body
LE: loop exit
PB: predicated region body
PF: predicated region fallthrough
CT: control target
= control target key end

     0   :  { %s406_s1 = inlined_call_operand.vmem [shape: bf16[128,128], index: 1, kind: input, shape index: {}]   ;;  %s407_s0 = inlined_call_operand.vmem [shape: f32[128,128], index: 0, kind: input, shape index: {}]   ;;  %s408_s2 = inlined_call_operand.vmem [shape: bf16[128,128], index: 2, kind: output, shape index: {}]  }
   0x1   :  { %v223_v0 = vld [vmem:[%s406_s1 + $0x38] sm:$0xff]  ;;  %v222_v1 = vld [vmem:[%s406_s1 + $0x30] sm:$0xff]  ;;  %v221_v2 = vld [vmem:[%s406_s1 + $0x28] sm:$0xff] }
   0x2   :  { %99 = vmatpush.bf16.msra.mxu0 %v223_v0  ;;  %271 = vmatpush.bf16.msra.mxu1 %v223_v0  ;;  %v220_v3 = vld [vmem:[%s406_s1 + $0x20] sm:$0xff]  ;;  %v219_v4 = vld [vmem:[%s406_s1 + $0x18] sm:$0xff]  ;;  %v218_v5 = vld [vmem:[%s406_s1 + $0x10] sm:$0xff] }
   0x3   :  { %272 = vmatpush.bf16.msra.mxu2 %v223_v0  ;;  %273 = vmatpush.bf16.msra.mxu3 %v223_v0  ;;  %v217_v6 = vld [vmem:[%s406_s1 + $0x8] sm:$0xff]  ;;  %v216_v7 = vld [vmem:[%s406_s1] sm:$0xff]  ;;  %v13_v20 = vld [vmem:[%s407_s0 + $0x10] sm:$0xff] }
   0x4   :  { %v11_v8 = vld [vmem:[%s407_s0] sm:$0xff]  ;;  %v12_v9 = vld [vmem:[%s407_s0 + $0x8] sm:$0xff]  ;;  %v14_v21 = vld [vmem:[%s407_s0 + $0x18] sm:$0xff] }
   0x5   :  { %v15_v10 = vld [vmem:[%s407_s0 + $0x20] sm:$0xff]  ;;  %v16_v11 = vld [vmem:[%s407_s0 + $0x28] sm:$0xff]  ;;  %v43_v16 = vpack.c.bf16 %v12_v9, %v11_v8  ;;  %v17_v22 = vld [vmem:[%s407_s0 + $0x30] sm:$0xff]  ;;  %v44_v28 = vpack.c.bf16 %v14_v21, %v13_v20 }
   0x6   :  { %100 = vmatpush.bf16.msra.mxu0 %v222_v1  ;;  %274 = vmatpush.bf16.msra.mxu1 %v222_v1  ;;  %v19_v12 = vld [vmem:[%s407_s0 + $0x40] sm:$0xff]  ;;  %v20_v13 = vld [vmem:[%s407_s0 + $0x48] sm:$0xff]  ;;  %v45_v17 = vpack.c.bf16 %v16_v11, %v15_v10  ;;  %v18_v23 = vld [vmem:[%s407_s0 + $0x38] sm:$0xff] }
   0x7   :  { %275 = vmatpush.bf16.msra.mxu2 %v222_v1  ;;  %276 = vmatpush.bf16.msra.mxu3 %v222_v1  ;;  %v23_v14 = vld [vmem:[%s407_s0 + $0x60] sm:$0xff]  ;;  %v24_v15 = vld [vmem:[%s407_s0 + $0x68] sm:$0xff]  ;;  %v47_v18 = vpack.c.bf16 %v20_v13, %v19_v12  ;;  %v21_v24 = vld [vmem:[%s407_s0 + $0x50] sm:$0xff]  ;;  %v46_v29 = vpack.c.bf16 %v18_v23, %v17_v22 }
   0x8   :  { %v49_v19 = vpack.c.bf16 %v24_v15, %v23_v14  ;;  %v22_v25 = vld [vmem:[%s407_s0 + $0x58] sm:$0xff]  ;;  %v25_v26 = vld [vmem:[%s407_s0 + $0x70] sm:$0xff] }
   0x9   :  { %v26_v27 = vld [vmem:[%s407_s0 + $0x78] sm:$0xff]  ;;  %v48_v30 = vpack.c.bf16 %v22_v25, %v21_v24 }
   0xa   :  { %101 = vmatpush.bf16.msra.mxu0 %v221_v2  ;;  %277 = vmatpush.bf16.msra.mxu1 %v221_v2  ;;  %v50_v31 = vpack.c.bf16 %v26_v27, %v25_v26 }
   0xb   :  { %278 = vmatpush.bf16.msra.mxu2 %v221_v2  ;;  %279 = vmatpush.bf16.msra.mxu3 %v221_v2 }
   0xe   :  { %102 = vmatpush.bf16.msra.mxu0 %v220_v3  ;;  %280 = vmatpush.bf16.msra.mxu1 %v220_v3 }
   0xf   :  { %281 = vmatpush.bf16.msra.mxu2 %v220_v3  ;;  %282 = vmatpush.bf16.msra.mxu3 %v220_v3 }
  0x12   :  { %103 = vmatpush.bf16.msra.mxu0 %v219_v4  ;;  %283 = vmatpush.bf16.msra.mxu1 %v219_v4 }
  0x13   :  { %284 = vmatpush.bf16.msra.mxu2 %v219_v4  ;;  %285 = vmatpush.bf16.msra.mxu3 %v219_v4 }
  0x16   :  { %104 = vmatpush.bf16.msra.mxu0 %v218_v5  ;;  %286 = vmatpush.bf16.msra.mxu1 %v218_v5 }
  0x17   :  { %287 = vmatpush.bf16.msra.mxu2 %v218_v5  ;;  %288 = vmatpush.bf16.msra.mxu3 %v218_v5 }
  0x1a   :  { %105 = vmatpush.bf16.msra.mxu0 %v217_v6  ;;  %289 = vmatpush.bf16.msra.mxu1 %v217_v6 }
  0x1b   :  { %290 = vmatpush.bf16.msra.mxu2 %v217_v6  ;;  %291 = vmatpush.bf16.msra.mxu3 %v217_v6 }
  0x1e   :  { %106 = vmatpush.bf16.msra.mxu0 %v216_v7  ;;  %292 = vmatpush.bf16.msra.mxu1 %v216_v7 }
  0x1f   :  { %293 = vmatpush.bf16.msra.mxu2 %v216_v7  ;;  %294 = vmatpush.bf16.msra.mxu3 %v216_v7 }
  0x21   :  { %107 = vmatmul.bf16.vlgmr.msra.gmra.mxu0 %v43_v16  ;;  %117 = vmatmul.bf16.vlgmr.msra.gmra.mxu1 %v45_v17 }
  0x22   :  { %127 = vmatmul.bf16.vlgmr.msra.gmra.mxu2 %v47_v18  ;;  %137 = vmatmul.bf16.vlgmr.msra.gmra.mxu3 %v49_v19 }
  0x31   :  { %112 = vmatmul.bf16.gmra.mxu0 %v44_v28  ;;  %122 = vmatmul.bf16.gmra.mxu1 %v46_v29 }
  0x32   :  { %132 = vmatmul.bf16.gmra.mxu2 %v48_v30  ;;  %142 = vmatmul.bf16.gmra.mxu3 %v50_v31 }
  0x9e   :  { %v108_v32 = vpop.f32.mrf.mxu0  ;;  %v118_v33 = vpop.f32.mrf.mxu1 }
  0xa5   :  { %v128_v34 = vpop.f32.mrf.mxu2  ;;  %v138_v35 = vpop.f32.mrf.mxu3 }
  0xa6   :  { %v110_v36 = vpop.f32.mrf.mxu0  ;;  %v120_v37 = vpop.f32.mrf.mxu1 }
  0xa7   :  { %v227_v38 = vpack.c.bf16 %v110_v36, %v108_v32  ;;  %v237_v39 = vpack.c.bf16 %v120_v37, %v118_v33 }
  0xa9   :  { %228 = vst [vmem:[%s408_s2] sm:$0xff] %v227_v38  }
  0xaa   :  { %265 = vst [vmem:[%s408_s2 + $0x10] sm:$0xff] %v237_v39  }
  0xad   :  { %v130_v40 = vpop.f32.mrf.mxu2  ;;  %v140_v41 = vpop.f32.mrf.mxu3 }
  0xae   :  { %v247_v42 = vpack.c.bf16 %v130_v40, %v128_v34  ;;  %v257_v43 = vpack.c.bf16 %v140_v41, %v138_v35  ;;  %v113_v44 = vpop.f32.mrf.mxu0  ;;  %v123_v45 = vpop.f32.mrf.mxu1 }
  0xb0   :  { %267 = vst [vmem:[%s408_s2 + $0x20] sm:$0xff] %v247_v42  }
  0xb1   :  { %269 = vst [vmem:[%s408_s2 + $0x30] sm:$0xff] %v257_v43  }
  0xb5   :  { %v133_v46 = vpop.f32.mrf.mxu2  ;;  %v143_v47 = vpop.f32.mrf.mxu3 }
  0xb6   :  { %v115_v48 = vpop.f32.mrf.mxu0  ;;  %v125_v49 = vpop.f32.mrf.mxu1 }
  0xb7   :  { %v232_v50 = vpack.c.bf16 %v115_v48, %v113_v44  ;;  %v242_v51 = vpack.c.bf16 %v125_v49, %v123_v45 }
  0xb9   :  { %264 = vst [vmem:[%s408_s2 + $0x8] sm:$0xff] %v232_v50  }
  0xba   :  { %266 = vst [vmem:[%s408_s2 + $0x18] sm:$0xff] %v242_v51  }
  0xbd   :  { %v135_v52 = vpop.f32.mrf.mxu2  ;;  %v145_v53 = vpop.f32.mrf.mxu3 }
  0xbe   :  { %v252_v54 = vpack.c.bf16 %v135_v52, %v133_v46  ;;  %v262_v55 = vpack.c.bf16 %v145_v53, %v143_v47 }
  0xc0   :  { %268 = vst [vmem:[%s408_s2 + $0x28] sm:$0xff] %v252_v54  }
  0xc1   :  { %270 = vst [vmem:[%s408_s2 + $0x38] sm:$0xff] %v262_v55  }

// kernel: graph_conflator_forward.19
= control target key start
LH: loop header
LB: loop body
LE: loop exit
PB: predicated region body
PF: predicated region fallthrough
CT: control target
= control target key end

     0   :  { %s705_s1 = inlined_call_operand.vmem [shape: bf16[128,256], index: 1, kind: input, shape index: {}]   ;;  %s706_s0 = inlined_call_operand.vmem [shape: f32[128,128], index: 0, kind: input, shape index: {}]   ;;  %s707_s2 = inlined_call_operand.vmem [shape: bf16[128,128], index: 2, kind: output, shape index: {0}]   ;;  %s708_s3 = inlined_call_operand.vmem [shape: bf16[128,128], index: 3, kind: output, shape index: {1}]  }
   0x1   :  { %v361_v0 = vld [vmem:[%s705_s1 + $0x70] sm:$0xf]  ;;  %v382_v1 = vld [vmem:[%s705_s1 + $0x74] sm:$0xf0]  ;;  %v381_v2 = vld [vmem:[%s705_s1 + $0x74] sm:$0xf] }
   0x2   :  { %v362_v3 = vor.u32 %v382_v1, %v361_v0  ;;  %v363_v4 = vld [vmem:[%s705_s1 + $0x78] sm:$0xf0]  ;;  %v353_v5 = vld [vmem:[%s705_s1 + $0x60] sm:$0xf]  ;;  %v380_v6 = vld [vmem:[%s705_s1 + $0x64] sm:$0xf0] }
   0x3   :  { %v366_v7 = vor.u32 %v381_v2, %v363_v4  ;;  %v379_v8 = vld [vmem:[%s705_s1 + $0x64] sm:$0xf]  ;;  %v355_v9 = vld [vmem:[%s705_s1 + $0x68] sm:$0xf0]  ;;  %v354_v10 = vor.u32 %v380_v6, %v353_v5  ;;  %v345_v12 = vld [vmem:[%s705_s1 + $0x50] sm:$0xf] }
   0x4   :  { %133 = vmatpush.bf16.msra.mxu0 %v362_v3  ;;  %477 = vmatpush.bf16.msra.mxu2 %v362_v3  ;;  %v358_v11 = vor.u32 %v379_v8, %v355_v9  ;;  %v378_v13 = vld [vmem:[%s705_s1 + $0x54] sm:$0xf0]  ;;  %v377_v14 = vld [vmem:[%s705_s1 + $0x54] sm:$0xf]  ;;  %v347_v15 = vld [vmem:[%s705_s1 + $0x58] sm:$0xf0] }
   0x5   :  { %182 = vmatpush.bf16.msra.mxu1 %v366_v7  ;;  %485 = vmatpush.bf16.msra.mxu3 %v366_v7  ;;  %v346_v16 = vor.u32 %v378_v13, %v345_v12  ;;  %v350_v17 = vor.u32 %v377_v14, %v347_v15  ;;  %v337_v18 = vld [vmem:[%s705_s1 + $0x40] sm:$0xf]  ;;  %v376_v19 = vld [vmem:[%s705_s1 + $0x44] sm:$0xf0]  ;;  %v375_v20 = vld [vmem:[%s705_s1 + $0x44] sm:$0xf] }
   0x6   :  { %v339_v21 = vld [vmem:[%s705_s1 + $0x48] sm:$0xf0]  ;;  %v338_v22 = vor.u32 %v376_v19, %v337_v18  ;;  %v329_v24 = vld [vmem:[%s705_s1 + $0x30] sm:$0xf]  ;;  %v374_v25 = vld [vmem:[%s705_s1 + $0x34] sm:$0xf0] }
   0x7   :  { %v342_v23 = vor.u32 %v375_v20, %v339_v21  ;;  %v373_v26 = vld [vmem:[%s705_s1 + $0x34] sm:$0xf]  ;;  %v331_v27 = vld [vmem:[%s705_s1 + $0x38] sm:$0xf0]  ;;  %v330_v28 = vor.u32 %v374_v25, %v329_v24  ;;  %v321_v30 = vld [vmem:[%s705_s1 + $0x20] sm:$0xf] }
   0x8   :  { %134 = vmatpush.bf16.msra.mxu0 %v354_v10  ;;  %478 = vmatpush.bf16.msra.mxu2 %v354_v10  ;;  %v334_v29 = vor.u32 %v373_v26, %v331_v27  ;;  %v372_v31 = vld [vmem:[%s705_s1 + $0x24] sm:$0xf0]  ;;  %v371_v32 = vld [vmem:[%s705_s1 + $0x24] sm:$0xf]  ;;  %v323_v33 = vld [vmem:[%s705_s1 + $0x28] sm:$0xf0] }
   0x9   :  { %183 = vmatpush.bf16.msra.mxu1 %v358_v11  ;;  %486 = vmatpush.bf16.msra.mxu3 %v358_v11  ;;  %v322_v34 = vor.u32 %v372_v31, %v321_v30  ;;  %v326_v35 = vor.u32 %v371_v32, %v323_v33  ;;  %v313_v36 = vld [vmem:[%s705_s1 + $0x10] sm:$0xf]  ;;  %v370_v37 = vld [vmem:[%s705_s1 + $0x14] sm:$0xf0]  ;;  %v369_v38 = vld [vmem:[%s705_s1 + $0x14] sm:$0xf] }
   0xa   :  { %v315_v39 = vld [vmem:[%s705_s1 + $0x18] sm:$0xf0]  ;;  %v314_v40 = vor.u32 %v370_v37, %v313_v36  ;;  %v305_v42 = vld [vmem:[%s705_s1] sm:$0xf]  ;;  %v368_v43 = vld [vmem:[%s705_s1 + $0x4] sm:$0xf0] }
   0xb   :  { %v318_v41 = vor.u32 %v369_v38, %v315_v39  ;;  %v367_v44 = vld [vmem:[%s705_s1 + $0x4] sm:$0xf]  ;;  %v307_v45 = vld [vmem:[%s705_s1 + $0x8] sm:$0xf0]  ;;  %v306_v47 = vor.u32 %v368_v43, %v305_v42  ;;  %v15_v54 = vld [vmem:[%s706_s0 + $0x10] sm:$0xff] }
   0xc   :  { %135 = vmatpush.bf16.msra.mxu0 %v346_v16  ;;  %479 = vmatpush.bf16.msra.mxu2 %v346_v16  ;;  %v13_v46 = vld [vmem:[%s706_s0] sm:$0xff]  ;;  %v14_v48 = vld [vmem:[%s706_s0 + $0x8] sm:$0xff]  ;;  %v310_v51 = vor.u32 %v367_v44, %v307_v45  ;;  %v16_v55 = vld [vmem:[%s706_s0 + $0x18] sm:$0xff] }
   0xd   :  { %184 = vmatpush.bf16.msra.mxu1 %v350_v17  ;;  %487 = vmatpush.bf16.msra.mxu3 %v350_v17  ;;  %v21_v49 = vld [vmem:[%s706_s0 + $0x40] sm:$0xff]  ;;  %v22_v50 = vld [vmem:[%s706_s0 + $0x48] sm:$0xff]  ;;  %v45_v52 = vpack.c.bf16 %v14_v48, %v13_v46  ;;  %v23_v56 = vld [vmem:[%s706_s0 + $0x50] sm:$0xff]  ;;  %v46_v58 = vpack.c.bf16 %v16_v55, %v15_v54 }
   0xe   :  { %v49_v53 = vpack.c.bf16 %v22_v50, %v21_v49  ;;  %v24_v57 = vld [vmem:[%s706_s0 + $0x58] sm:$0xff]  ;;  %v17_v60 = vld [vmem:[%s706_s0 + $0x20] sm:$0xff]  ;;  %v18_v61 = vld [vmem:[%s706_s0 + $0x28] sm:$0xff] }
   0xf   :  { %v50_v59 = vpack.c.bf16 %v24_v57, %v23_v56  ;;  %v25_v62 = vld [vmem:[%s706_s0 + $0x60] sm:$0xff]  ;;  %v26_v63 = vld [vmem:[%s706_s0 + $0x68] sm:$0xff]  ;;  %v47_v0 = vpack.c.bf16 %v18_v61, %v17_v60  ;;  %v19_v2 = vld [vmem:[%s706_s0 + $0x30] sm:$0xff] }
  0x10   :  { %136 = vmatpush.bf16.msra.mxu0 %v338_v22  ;;  %480 = vmatpush.bf16.msra.mxu2 %v338_v22  ;;  %v51_v1 = vpack.c.bf16 %v26_v63, %v25_v62  ;;  %v20_v3 = vld [vmem:[%s706_s0 + $0x38] sm:$0xff]  ;;  %v27_v4 = vld [vmem:[%s706_s0 + $0x70] sm:$0xff] }
  0x11   :  { %185 = vmatpush.bf16.msra.mxu1 %v342_v23  ;;  %488 = vmatpush.bf16.msra.mxu3 %v342_v23  ;;  %v28_v5 = vld [vmem:[%s706_s0 + $0x78] sm:$0xff]  ;;  %v48_v6 = vpack.c.bf16 %v20_v3, %v19_v2 }
  0x12   :  { %v52_v7 = vpack.c.bf16 %v28_v5, %v27_v4 }
  0x14   :  { %137 = vmatpush.bf16.msra.mxu0 %v330_v28  ;;  %481 = vmatpush.bf16.msra.mxu2 %v330_v28 }
  0x15   :  { %186 = vmatpush.bf16.msra.mxu1 %v334_v29  ;;  %489 = vmatpush.bf16.msra.mxu3 %v334_v29 }
  0x18   :  { %138 = vmatpush.bf16.msra.mxu0 %v322_v34  ;;  %482 = vmatpush.bf16.msra.mxu2 %v322_v34 }
  0x19   :  { %187 = vmatpush.bf16.msra.mxu1 %v326_v35  ;;  %490 = vmatpush.bf16.msra.mxu3 %v326_v35 }
  0x1c   :  { %139 = vmatpush.bf16.msra.mxu0 %v314_v40  ;;  %483 = vmatpush.bf16.msra.mxu2 %v314_v40 }
  0x1d   :  { %188 = vmatpush.bf16.msra.mxu1 %v318_v41  ;;  %491 = vmatpush.bf16.msra.mxu3 %v318_v41 }
  0x20   :  { %140 = vmatpush.bf16.msra.mxu0 %v306_v47  ;;  %484 = vmatpush.bf16.msra.mxu2 %v306_v47 }
  0x21   :  { %189 = vmatpush.bf16.msra.mxu1 %v310_v51  ;;  %492 = vmatpush.bf16.msra.mxu3 %v310_v51 }
  0x23   :  { %141 = vmatmul.bf16.vlgmr.msra.gmra.mxu0 %v45_v52  ;;  %161 = vmatmul.bf16.vlgmr.msra.gmra.mxu2 %v49_v53 }
  0x24   :  { %190 = vmatmul.bf16.vlgmr.msra.gmra.mxu1 %v45_v52  ;;  %210 = vmatmul.bf16.vlgmr.msra.gmra.mxu3 %v49_v53 }
  0x33   :  { %146 = vmatmul.bf16.gmra.mxu0 %v46_v58  ;;  %166 = vmatmul.bf16.gmra.mxu2 %v50_v59 }
  0x34   :  { %195 = vmatmul.bf16.gmra.mxu1 %v46_v58  ;;  %215 = vmatmul.bf16.gmra.mxu3 %v50_v59 }
  0x43   :  { %151 = vmatmul.bf16.gmra.mxu0 %v47_v0  ;;  %171 = vmatmul.bf16.gmra.mxu2 %v51_v1 }
  0x44   :  { %200 = vmatmul.bf16.gmra.mxu1 %v47_v0  ;;  %220 = vmatmul.bf16.gmra.mxu3 %v51_v1 }
  0x53   :  { %156 = vmatmul.bf16.gmra.mxu0 %v48_v6  ;;  %176 = vmatmul.bf16.gmra.mxu2 %v52_v7 }
  0x54   :  { %205 = vmatmul.bf16.gmra.mxu1 %v48_v6  ;;  %225 = vmatmul.bf16.gmra.mxu3 %v52_v7 }
  0xa0   :  { %v142_v8 = vpop.f32.mrf.mxu0 }
  0xa1   :  { %v191_v9 = vpop.f32.mrf.mxu1 }
  0xa6   :  { %v162_v10 = vpop.f32.mrf.mxu2 }
  0xa7   :  { %v211_v11 = vpop.f32.mrf.mxu3 }
  0xa8   :  { %v144_v12 = vpop.f32.mrf.mxu0 }
  0xa9   :  { %v386_v13 = vpack.c.bf16 %v144_v12, %v142_v8  ;;  %v193_v14 = vpop.f32.mrf.mxu1 }
  0xaa   :  { %v426_v15 = vpack.c.bf16 %v193_v14, %v191_v9 }
  0xab   :  { %387 = vst [vmem:[%s707_s2] sm:$0xff] %v386_v13  }
  0xac   :  { %427 = vst [vmem:[%s708_s3] sm:$0xff] %v426_v15  }
  0xae   :  { %v164_v16 = vpop.f32.mrf.mxu2 }
  0xaf   :  { %v406_v17 = vpack.c.bf16 %v164_v16, %v162_v10  ;;  %v213_v18 = vpop.f32.mrf.mxu3 }
  0xb0   :  { %v446_v19 = vpack.c.bf16 %v213_v18, %v211_v11  ;;  %v147_v20 = vpop.f32.mrf.mxu0 }
  0xb1   :  { %466 = vst [vmem:[%s707_s2 + $0x20] sm:$0xff] %v406_v17   ;;  %v196_v21 = vpop.f32.mrf.mxu1 }
  0xb2   :  { %473 = vst [vmem:[%s708_s3 + $0x20] sm:$0xff] %v446_v19  }
  0xb6   :  { %v167_v22 = vpop.f32.mrf.mxu2 }
  0xb7   :  { %v216_v23 = vpop.f32.mrf.mxu3 }
  0xb8   :  { %v149_v24 = vpop.f32.mrf.mxu0 }
  0xb9   :  { %v391_v25 = vpack.c.bf16 %v149_v24, %v147_v20  ;;  %v198_v26 = vpop.f32.mrf.mxu1 }
  0xba   :  { %v431_v27 = vpack.c.bf16 %v198_v26, %v196_v21 }
  0xbb   :  { %463 = vst [vmem:[%s707_s2 + $0x8] sm:$0xff] %v391_v25  }
  0xbc   :  { %470 = vst [vmem:[%s708_s3 + $0x8] sm:$0xff] %v431_v27  }
  0xbe   :  { %v169_v28 = vpop.f32.mrf.mxu2 }
  0xbf   :  { %v411_v29 = vpack.c.bf16 %v169_v28, %v167_v22  ;;  %v218_v30 = vpop.f32.mrf.mxu3 }
  0xc0   :  { %v451_v31 = vpack.c.bf16 %v218_v30, %v216_v23  ;;  %v152_v32 = vpop.f32.mrf.mxu0 }
  0xc1   :  { %467 = vst [vmem:[%s707_s2 + $0x28] sm:$0xff] %v411_v29   ;;  %v201_v33 = vpop.f32.mrf.mxu1 }
  0xc2   :  { %474 = vst [vmem:[%s708_s3 + $0x28] sm:$0xff] %v451_v31  }
  0xc6   :  { %v172_v34 = vpop.f32.mrf.mxu2 }
  0xc7   :  { %v221_v35 = vpop.f32.mrf.mxu3 }
  0xc8   :  { %v154_v36 = vpop.f32.mrf.mxu0 }
  0xc9   :  { %v396_v37 = vpack.c.bf16 %v154_v36, %v152_v32  ;;  %v203_v38 = vpop.f32.mrf.mxu1 }
  0xca   :  { %v436_v39 = vpack.c.bf16 %v203_v38, %v201_v33 }
  0xcb   :  { %464 = vst [vmem:[%s707_s2 + $0x10] sm:$0xff] %v396_v37  }
  0xcc   :  { %471 = vst [vmem:[%s708_s3 + $0x10] sm:$0xff] %v436_v39  }
  0xce   :  { %v174_v40 = vpop.f32.mrf.mxu2 }
  0xcf   :  { %v416_v41 = vpack.c.bf16 %v174_v40, %v172_v34  ;;  %v223_v42 = vpop.f32.mrf.mxu3 }
  0xd0   :  { %v456_v43 = vpack.c.bf16 %v223_v42, %v221_v35  ;;  %v157_v44 = vpop.f32.mrf.mxu0 }
  0xd1   :  { %468 = vst [vmem:[%s707_s2 + $0x30] sm:$0xff] %v416_v41   ;;  %v206_v45 = vpop.f32.mrf.mxu1 }
  0xd2   :  { %475 = vst [vmem:[%s708_s3 + $0x30] sm:$0xff] %v456_v43  }
  0xd6   :  { %v177_v46 = vpop.f32.mrf.mxu2 }
  0xd7   :  { %v226_v47 = vpop.f32.mrf.mxu3 }
  0xd8   :  { %v159_v48 = vpop.f32.mrf.mxu0 }
  0xd9   :  { %v401_v49 = vpack.c.bf16 %v159_v48, %v157_v44  ;;  %v208_v50 = vpop.f32.mrf.mxu1 }
  0xda   :  { %v441_v51 = vpack.c.bf16 %v208_v50, %v206_v45 }
  0xdb   :  { %465 = vst [vmem:[%s707_s2 + $0x18] sm:$0xff] %v401_v49  }
  0xdc   :  { %472 = vst [vmem:[%s708_s3 + $0x18] sm:$0xff] %v441_v51  }
  0xde   :  { %v179_v52 = vpop.f32.mrf.mxu2 }
  0xdf   :  { %v421_v53 = vpack.c.bf16 %v179_v52, %v177_v46  ;;  %v228_v54 = vpop.f32.mrf.mxu3 }
  0xe0   :  { %v461_v55 = vpack.c.bf16 %v228_v54, %v226_v47 }
  0xe1   :  { %469 = vst [vmem:[%s707_s2 + $0x38] sm:$0xff] %v421_v53  }
  0xe2   :  { %476 = vst [vmem:[%s708_s3 + $0x38] sm:$0xff] %v461_v55  }

// kernel: graph_conflator_forward.21
= control target key start
LH: loop header
LB: loop body
LE: loop exit
PB: predicated region body
PF: predicated region fallthrough
CT: control target
= control target key end

     0   :  { %v239_v16 = vlaneseq  ;;  %s1034_s1 = inlined_call_operand.vmem [shape: bf16[128,128], index: 1, kind: input, shape index: {}]   ;;  %s1035_s0 = inlined_call_operand.vmem [shape: bf16[128,128], index: 0, kind: input, shape index: {}]   ;;  %s1036_s2 = inlined_call_operand.vmem [shape: bf16[128,128], index: 2, kind: input, shape index: {}]   ;;  %s1037_s3 = inlined_call_operand.vmem [shape: f32[128,128], index: 3, kind: output, shape index: {}]  }
   0x1   :  { %v638_v0 = vld [vmem:[%s1034_s1 + $0x38] sm:$0xff]  ;;  %v637_v1 = vld [vmem:[%s1034_s1 + $0x30] sm:$0xff]  ;;  %v636_v2 = vld [vmem:[%s1034_s1 + $0x28] sm:$0xff] }
   0x2   :  { %158 = vmatpush.bf16.xpose.msra.mxu0 %v638_v0  ;;  %647 = vmatpush.bf16.xpose.msra.mxu2 %v638_v0  ;;  %v635_v3 = vld [vmem:[%s1034_s1 + $0x20] sm:$0xff]  ;;  %v634_v4 = vld [vmem:[%s1034_s1 + $0x18] sm:$0xff]  ;;  %v633_v5 = vld [vmem:[%s1034_s1 + $0x10] sm:$0xff]  ;;  %v795_v17 = vand.u32 127, %v239_v16 }
   0x3   :  { %v632_v6 = vld [vmem:[%s1034_s1 + $0x8] sm:$0xff]  ;;  %v631_v7 = vld [vmem:[%s1034_s1] sm:$0xff]  ;;  %v626_v9 = vld [vmem:[%s1035_s0 + $0x18] sm:$0xff] }
   0x4   :  { %v623_v8 = vld [vmem:[%s1035_s0] sm:$0xff]  ;;  %v624_v10 = vld [vmem:[%s1035_s0 + $0x8] sm:$0xff]  ;;  %v625_v12 = vld [vmem:[%s1035_s0 + $0x10] sm:$0xff]  ;;  %vm241_vm0 = vcmp.lt.s32.totalorder %v795_v17, 8 }
   0x5   :  { %v627_v11 = vld [vmem:[%s1035_s0 + $0x20] sm:$0xff]  ;;  %v628_v13 = vld [vmem:[%s1035_s0 + $0x28] sm:$0xff]  ;;  %v629_v14 = vld [vmem:[%s1035_s0 + $0x30] sm:$0xff] }
   0x6   :  { %v630_v15 = vld [vmem:[%s1035_s0 + $0x38] sm:$0xff] }
   0xa   :  { %159 = vmatpush.bf16.xpose.msra.mxu0 %v637_v1  ;;  %648 = vmatpush.bf16.xpose.msra.mxu2 %v637_v1 }
  0x12   :  { %160 = vmatpush.bf16.xpose.msra.mxu0 %v636_v2  ;;  %649 = vmatpush.bf16.xpose.msra.mxu2 %v636_v2 }
  0x1a   :  { %161 = vmatpush.bf16.xpose.msra.mxu0 %v635_v3  ;;  %650 = vmatpush.bf16.xpose.msra.mxu2 %v635_v3 }
  0x22   :  { %162 = vmatpush.bf16.xpose.msra.mxu0 %v634_v4  ;;  %651 = vmatpush.bf16.xpose.msra.mxu2 %v634_v4 }
  0x2a   :  { %163 = vmatpush.bf16.xpose.msra.mxu0 %v633_v5  ;;  %652 = vmatpush.bf16.xpose.msra.mxu2 %v633_v5 }
  0x32   :  { %164 = vmatpush.bf16.xpose.msra.mxu0 %v632_v6  ;;  %653 = vmatpush.bf16.xpose.msra.mxu2 %v632_v6 }
  0x3a   :  { %165 = vmatpush.bf16.xpose.msra.mxu0 %v631_v7  ;;  %654 = vmatpush.bf16.xpose.msra.mxu2 %v631_v7 }
  0x41   :  { %166 = vmatmul.bf16.vlgmr.msra.gmra.mxu0 %v623_v8  ;;  %181 = vmatmul.bf16.vlgmr.msra.gmra.mxu2 %v626_v9 }
  0x51   :  { %171 = vmatmul.bf16.gmra.mxu0 %v624_v10  ;;  %186 = vmatmul.bf16.gmra.mxu2 %v627_v11 }
  0x61   :  { %176 = vmatmul.bf16.gmra.mxu0 %v625_v12  ;;  %191 = vmatmul.bf16.gmra.mxu2 %v628_v13 }
  0x71   :  { %196 = vmatmul.bf16.gmra.mxu2 %v629_v14 }
  0x81   :  { %201 = vmatmul.bf16.gmra.mxu2 %v630_v15 }
  0xbe   :  { %v167_v18 = vpop.f32.mrf.mxu0 }
  0xbf   :  { %v207_v19 = vmul.f32 0.01, %v167_v18 }
  0xc1   :  { %v223_v20 = vmax.f32 %v167_v18, %v207_v19 }
  0xc3   :  { %v800_v21 = vsel %vm241_vm0, %v223_v20, -1e+30 }
  0xc4   :  { %v182_v22 = vpop.f32.mrf.mxu2  ;;  %258 = vmax.xlane.f32.xlu0 %v800_v21 }
  0xc5   :  { %v213_v47 = vmul.f32 0.01, %v182_v22 }
  0xc6   :  { %v169_v23 = vpop.f32.mrf.mxu0 }
  0xc7   :  { %v208_v24 = vmul.f32 0.01, %v169_v23  ;;  %v229_v52 = vmax.f32 %v182_v22, %v213_v47 }
  0xc9   :  { %v224_v25 = vmax.f32 %v169_v23, %v208_v24  ;;  %v841_v56 = vsel %vm241_vm0, %v229_v52, -1e+30 }
  0xcb   :  { %v805_v26 = vsel %vm241_vm0, %v224_v25, -1e+30 }
  0xcc   :  { %v184_v27 = vpop.f32.mrf.mxu2  ;;  %260 = vmax.xlane.f32.xlu0 %v805_v26 }
  0xcd   :  { %v214_v59 = vmul.f32 0.01, %v184_v27 }
  0xce   :  { %v172_v28 = vpop.f32.mrf.mxu0 }
  0xcf   :  { %v209_v29 = vmul.f32 0.01, %v172_v28  ;;  %v230_v62 = vmax.f32 %v184_v27, %v214_v59 }
  0xd1   :  { %v225_v30 = vmax.f32 %v172_v28, %v209_v29  ;;  %v852_v2 = vsel %vm241_vm0, %v230_v62, -1e+30 }
  0xd3   :  { %v810_v31 = vsel %vm241_vm0, %v225_v30, -1e+30 }
  0xd4   :  { %v812_v32 = vpop.f32.mrf.mxu2  ;;  %262 = vmax.xlane.f32.xlu1 %v810_v31 }
  0xd6   :  { %v174_v33 = vpop.f32.mrf.mxu0 }
  0xd7   :  { %v210_v34 = vmul.f32 0.01, %v174_v33 }
  0xd9   :  { %v226_v35 = vmax.f32 %v174_v33, %v210_v34 }
  0xdb   :  { %v817_v36 = vsel %vm241_vm0, %v226_v35, -1e+30 }
  0xdc   :  { %v189_v37 = vpop.f32.mrf.mxu2  ;;  %264 = vmax.xlane.f32.xlu1 %v817_v36 }
  0xdd   :  { %v216_v6 = vmul.f32 0.01, %v189_v37 }
  0xde   :  { %v177_v38 = vpop.f32.mrf.mxu0 }
  0xdf   :  { %v211_v39 = vmul.f32 0.01, %v177_v38  ;;  %v232_v9 = vmax.f32 %v189_v37, %v216_v6 }
  0xe1   :  { %v227_v40 = vmax.f32 %v177_v38, %v211_v39  ;;  %v867_v10 = vsel %vm241_vm0, %v232_v9, -1e+30 }
  0xe3   :  { %v822_v41 = vsel %vm241_vm0, %v227_v40, -1e+30 }
  0xe4   :  { %v192_v42 = vpop.f32.mrf.mxu2  ;;  %266 = vmax.xlane.f32.xlu0 %v822_v41 }
  0xe5   :  { %v217_v43 = vmul.f32 0.01, %v192_v42 }
  0xe6   :  { %v179_v44 = vpop.f32.mrf.mxu0 }
  0xe7   :  { %v233_v45 = vmax.f32 %v192_v42, %v217_v43  ;;  %v212_v46 = vmul.f32 0.01, %v179_v44 }
  0xe9   :  { %v228_v48 = vmax.f32 %v179_v44, %v212_v46  ;;  %v827_v49 = vsel %vm241_vm0, %v233_v45, -1e+30 }
  0xea   :  { %278 = vmax.xlane.f32.xlu2 %v827_v49 }
  0xeb   :  { %v832_v50 = vsel %vm241_vm0, %v228_v48, -1e+30 }
  0xec   :  { %v194_v51 = vpop.f32.mrf.mxu2  ;;  %268 = vmax.xlane.f32.xlu1 %v832_v50 }
  0xed   :  { %v218_v53 = vmul.f32 0.01, %v194_v51 }
  0xef   :  { %v234_v54 = vmax.f32 %v194_v51, %v218_v53 }
  0xf1   :  { %v837_v55 = vsel %vm241_vm0, %v234_v54, -1e+30 }
  0xf2   :  { %280 = vmax.xlane.f32.xlu2 %v837_v55 }
  0xf4   :  { %v197_v57 = vpop.f32.mrf.mxu2  ;;  %270 = vmax.xlane.f32.xlu1 %v841_v56 }
  0xf5   :  { %v219_v58 = vmul.f32 0.01, %v197_v57 }
  0xf7   :  { %v235_v60 = vmax.f32 %v197_v57, %v219_v58 }
  0xf9   :  { %v847_v61 = vsel %vm241_vm0, %v235_v60, -1e+30 }
  0xfa   :  { %282 = vmax.xlane.f32.xlu2 %v847_v61 }
  0xfc   :  { %v199_v63 = vpop.f32.mrf.mxu2 }
  0xfd   :  { %v220_v0 = vmul.f32 0.01, %v199_v63 }
  0xff   :  { %v236_v1 = vmax.f32 %v199_v63, %v220_v0 }
 0x101   :  { %v856_v3 = vsel %vm241_vm0, %v236_v1, -1e+30 }
 0x102   :  { %272 = vmax.xlane.f32.xlu2 %v852_v2  ;;  %284 = vmax.xlane.f32.xlu0 %v856_v3 }
 0x104   :  { %v202_v4 = vpop.f32.mrf.mxu2 }
 0x105   :  { %v221_v5 = vmul.f32 0.01, %v202_v4 }
 0x107   :  { %v237_v7 = vmax.f32 %v202_v4, %v221_v5  ;;  %v644_v4 = vld [vmem:[%s1036_s2 + $0x28] sm:$0xff] }
 0x109   :  { %v862_v8 = vsel %vm241_vm0, %v237_v7, -1e+30 }
 0x10a   :  { %286 = vmax.xlane.f32.xlu2 %v862_v8 }
 0x10c   :  { %v204_v14 = vpop.f32.mrf.mxu2 }
 0x10d   :  { %v222_v19 = vmul.f32 0.01, %v204_v14 }
 0x10f   :  { %v238_v22 = vmax.f32 %v204_v14, %v222_v19  ;;  %v643_v14 = vld [vmem:[%s1036_s2 + $0x20] sm:$0xff] }
 0x110   :  { %v639_v19 = vld [vmem:[%s1036_s2] sm:$0xff] }
 0x111   :  { %v881_v28 = vsel %vm241_vm0, %v238_v22, -1e+30 }
 0x112   :  { %276 = vmax.xlane.f32.xlu2 %v867_v10 }
 0x137   :  { %v259_v11 = vpop.xlane.xlu0 %258 }
 0x138   :  { %v290_v12 = vsub.f32 %v800_v21, %v259_v11  ;;  %v215_v21 = vmul.f32 0.01, %v812_v32 }
 0x13a   :  { %v306_v13 = vmul.f32 1.442695, %v290_v12 }
 0x13c   :  { %663 = vpow2.f32 %v306_v13 }
 0x13f   :  { %v261_v15 = vpop.xlane.xlu0 %260 }
 0x140   :  { %v291_v16 = vsub.f32 %v805_v26, %v261_v15  ;;  %v231_v26 = vmax.f32 %v812_v32, %v215_v21  ;;  %v642_v15 = vld [vmem:[%s1036_s2 + $0x18] sm:$0xff] }
 0x142   :  { %v872_v18 = vpop.eup %663  ;;  %v308_v20 = vmul.f32 1.442695, %v291_v16  ;;  %v891_v34 = vsel %vm241_vm0, %v231_v26, -1e+30  ;;  %v640_v16 = vld [vmem:[%s1036_s2 + $0x8] sm:$0xff] }
 0x143   :  { %338 = vadd.xlane.f32.xlu0 %v872_v18 }
 0x144   :  { %665 = vpow2.f32 %v308_v20 }
 0x147   :  { %v263_v23 = vpop.xlane.xlu1 %262 }
 0x148   :  { %v292_v24 = vsub.f32 %v810_v31, %v263_v23 }
 0x14a   :  { %v876_v25 = vpop.eup %665  ;;  %v310_v27 = vmul.f32 1.442695, %v292_v24 }
 0x14b   :  { %288 = vmax.xlane.f32.xlu0 %v881_v28  ;;  %340 = vadd.xlane.f32.xlu1 %v876_v25 }
 0x14c   :  { %667 = vpow2.f32 %v310_v27 }
 0x14f   :  { %v265_v29 = vpop.xlane.xlu1 %264 }
 0x150   :  { %v293_v30 = vsub.f32 %v817_v36, %v265_v29 }
 0x152   :  { %v887_v31 = vpop.eup %667  ;;  %v312_v33 = vmul.f32 1.442695, %v293_v30 }
 0x153   :  { %342 = vadd.xlane.f32.xlu0 %v887_v31  ;;  %274 = vmax.xlane.f32.xlu1 %v891_v34 }
 0x154   :  { %669 = vpow2.f32 %v312_v33 }
 0x157   :  { %v267_v35 = vpop.xlane.xlu0 %266 }
 0x158   :  { %v294_v37 = vsub.f32 %v822_v41, %v267_v35 }
 0x15a   :  { %v896_v38 = vpop.eup %669  ;;  %v314_v32 = vmul.f32 1.442695, %v294_v37 }
 0x15b   :  { %344 = vadd.xlane.f32.xlu1 %v896_v38 }
 0x15c   :  { %671 = vpow2.f32 %v314_v32 }
 0x15d   :  { %v279_v36 = vpop.xlane.xlu2 %278 }
 0x15e   :  { %v300_v39 = vsub.f32 %v827_v49, %v279_v36 }
 0x15f   :  { %v269_v17 = vpop.xlane.xlu1 %268 }
 0x160   :  { %v326_v40 = vmul.f32 1.442695, %v300_v39  ;;  %v295_v42 = vsub.f32 %v832_v50, %v269_v17 }
 0x162   :  { %v901_v43 = vpop.eup %671  ;;  %673 = vpow2.f32 %v326_v40  ;;  %v316_v44 = vmul.f32 1.442695, %v295_v42 }
 0x163   :  { %346 = vadd.xlane.f32.xlu1 %v901_v43 }
 0x164   :  { %675 = vpow2.f32 %v316_v44 }
 0x165   :  { %v281_v41 = vpop.xlane.xlu2 %280 }
 0x166   :  { %v301_v45 = vsub.f32 %v837_v55, %v281_v41  ;;  %v646_v55 = vld [vmem:[%s1036_s2 + $0x38] sm:$0xff] }
 0x167   :  { %v271_v46 = vpop.xlane.xlu1 %270  ;;  %458 = vmatpush.bf16.msra.mxu1 %v646_v55  ;;  %655 = vmatpush.bf16.msra.mxu3 %v646_v55 }
 0x168   :  { %v905_v47 = vpop.eup %673  ;;  %v328_v48 = vmul.f32 1.442695, %v301_v45  ;;  %v296_v49 = vsub.f32 %v841_v56, %v271_v46  ;;  %v645_v56 = vld [vmem:[%s1036_s2 + $0x30] sm:$0xff] }
 0x169   :  { %358 = vadd.xlane.f32.xlu2 %v905_v47 }
 0x16a   :  { %677 = vpow2.f32 %v328_v48  ;;  %v318_v50 = vmul.f32 1.442695, %v296_v49  ;;  %v910_v53 = vpop.eup %675 }
 0x16b   :  { %459 = vmatpush.bf16.msra.mxu1 %v645_v56  ;;  %656 = vmatpush.bf16.msra.mxu3 %v645_v56 }
 0x16c   :  { %679 = vpow2.f32 %v318_v50 }
 0x16d   :  { %v283_v51 = vpop.xlane.xlu2 %282 }
 0x16e   :  { %v302_v52 = vsub.f32 %v847_v61, %v283_v51 }
 0x16f   :  { %460 = vmatpush.bf16.msra.mxu1 %v644_v4  ;;  %657 = vmatpush.bf16.msra.mxu3 %v644_v4 }
 0x170   :  { %v912_v54 = vpop.eup %677  ;;  %v330_v57 = vmul.f32 1.442695, %v302_v52 }
 0x171   :  { %360 = vadd.xlane.f32.xlu0 %v912_v54  ;;  %348 = vadd.xlane.f32.xlu2 %v910_v53 }
 0x172   :  { %681 = vpow2.f32 %v330_v57  ;;  %v924_v62 = vpop.eup %679 }
 0x173   :  { %461 = vmatpush.bf16.msra.mxu1 %v643_v14  ;;  %658 = vmatpush.bf16.msra.mxu3 %v643_v14 }
 0x175   :  { %v273_v58 = vpop.xlane.xlu2 %272  ;;  %v285_v59 = vpop.xlane.xlu0 %284 }
 0x176   :  { %v297_v60 = vsub.f32 %v852_v2, %v273_v58  ;;  %v303_v61 = vsub.f32 %v856_v3, %v285_v59 }
 0x177   :  { %462 = vmatpush.bf16.msra.mxu1 %v642_v15  ;;  %659 = vmatpush.bf16.msra.mxu3 %v642_v15 }
 0x178   :  { %v926_v63 = vpop.eup %681  ;;  %v320_v0 = vmul.f32 1.442695, %v297_v60  ;;  %v332_v1 = vmul.f32 1.442695, %v303_v61 }
 0x179   :  { %362 = vadd.xlane.f32.xlu0 %v926_v63  ;;  %350 = vadd.xlane.f32.xlu2 %v924_v62 }
 0x17a   :  { %683 = vpow2.f32 %v320_v0 }
 0x17b   :  { %685 = vpow2.f32 %v332_v1 }
 0x17d   :  { %v287_v2 = vpop.xlane.xlu2 %286 }
 0x17e   :  { %v304_v3 = vsub.f32 %v862_v8, %v287_v2 }
 0x180   :  { %v934_v5 = vpop.eup %683  ;;  %v334_v6 = vmul.f32 1.442695, %v304_v3 }
 0x181   :  { %v936_v7 = vpop.eup %685  ;;  %352 = vadd.xlane.f32.xlu0 %v934_v5 }
 0x182   :  { %687 = vpow2.f32 %v334_v6  ;;  %364 = vadd.xlane.f32.xlu1 %v936_v7 }
 0x185   :  { %v277_v9 = vpop.xlane.xlu2 %276 }
 0x186   :  { %v299_v11 = vsub.f32 %v867_v10, %v277_v9  ;;  %v641_v10 = vld [vmem:[%s1036_s2 + $0x10] sm:$0xff] }
 0x187   :  { %463 = vmatpush.bf16.msra.mxu1 %v641_v10  ;;  %660 = vmatpush.bf16.msra.mxu3 %v641_v10 }
 0x188   :  { %v941_v12 = vpop.eup %687  ;;  %v324_v13 = vmul.f32 1.442695, %v299_v11 }
 0x18a   :  { %689 = vpow2.f32 %v324_v13  ;;  %366 = vadd.xlane.f32.xlu1 %v941_v12 }
 0x18b   :  { %464 = vmatpush.bf16.msra.mxu1 %v640_v16  ;;  %661 = vmatpush.bf16.msra.mxu3 %v640_v16 }
 0x18f   :  { %465 = vmatpush.bf16.msra.mxu1 %v639_v19  ;;  %662 = vmatpush.bf16.msra.mxu3 %v639_v19 }
 0x190   :  { %v944_v8 = vpop.eup %689 }
 0x192   :  { %356 = vadd.xlane.f32.xlu1 %v944_v8 }
 0x1b6   :  { %v339_v20 = vpop.xlane.xlu0 %338 }
 0x1b7   :  { %691 = vrcp.f32 %v339_v20 }
 0x1bd   :  { %v692_v27 = vpop.eup %691 }
 0x1be   :  { %v289_v22 = vpop.xlane.xlu0 %288  ;;  %v341_v23 = vpop.xlane.xlu1 %340  ;;  %v386_v30 = vmul.f32 %v692_v27, %v872_v18 }
 0x1bf   :  { %v305_v24 = vsub.f32 %v881_v28, %v289_v22  ;;  %693 = vrcp.f32 %v341_v23 }
 0x1c1   :  { %v336_v21 = vmul.f32 1.442695, %v305_v24 }
 0x1c3   :  { %695 = vpow2.f32 %v336_v21 }
 0x1c5   :  { %v694_v26 = vpop.eup %693 }
 0x1c6   :  { %v275_v29 = vpop.xlane.xlu1 %274  ;;  %v387_v33 = vmul.f32 %v694_v26, %v876_v25  ;;  %v343_v39 = vpop.xlane.xlu0 %342 }
 0x1c7   :  { %v298_v35 = vsub.f32 %v891_v34, %v275_v29 }
 0x1c8   :  { %v402_v37 = vpack.c.bf16 %v387_v33, %v386_v30 }
 0x1c9   :  { %v966_v32 = vpop.eup %695  ;;  %v322_v36 = vmul.f32 1.442695, %v298_v35 }
 0x1ca   :  { %368 = vadd.xlane.f32.xlu2 %v966_v32  ;;  %466 = vmatmul.bf16.vlgmr.msra.gmra.mxu1 %v402_v37 }
 0x1cb   :  { %697 = vpow2.f32 %v322_v36 }
 0x1cc   :  { %699 = vrcp.f32 %v343_v39 }
 0x1ce   :  { %v345_v28 = vpop.xlane.xlu1 %344 }
 0x1cf   :  { %701 = vrcp.f32 %v345_v28 }
 0x1d1   :  { %v969_v17 = vpop.eup %697 }
 0x1d2   :  { %354 = vadd.xlane.f32.xlu0 %v969_v17  ;;  %v700_v18 = vpop.eup %699 }
 0x1d3   :  { %v388_v34 = vmul.f32 %v700_v18, %v887_v31 }
 0x1d5   :  { %v702_v25 = vpop.eup %701 }
 0x1d6   :  { %v389_v40 = vmul.f32 %v702_v25, %v896_v38  ;;  %v347_v41 = vpop.xlane.xlu1 %346 }
 0x1d8   :  { %v403_v42 = vpack.c.bf16 %v389_v40, %v388_v34 }
 0x1da   :  { %471 = vmatmul.bf16.gmra.mxu1 %v403_v42 }
 0x1dc   :  { %v359_v44 = vpop.xlane.xlu2 %358 }
 0x1dd   :  { %703 = vrcp.f32 %v359_v44 }
 0x1de   :  { %705 = vrcp.f32 %v347_v41 }
 0x1e3   :  { %v704_v48 = vpop.eup %703 }
 0x1e4   :  { %v361_v45 = vpop.xlane.xlu0 %360  ;;  %v349_v46 = vpop.xlane.xlu2 %348  ;;  %v396_v57 = vmul.f32 %v704_v48, %v905_v47 }
 0x1e5   :  { %707 = vrcp.f32 %v361_v45  ;;  %v706_v49 = vpop.eup %705 }
 0x1e6   :  { %709 = vrcp.f32 %v349_v46  ;;  %v390_v38 = vmul.f32 %v706_v49, %v901_v43 }
 0x1eb   :  { %v708_v50 = vpop.eup %707 }
 0x1ec   :  { %v710_v51 = vpop.eup %709  ;;  %v363_v52 = vpop.xlane.xlu0 %362  ;;  %v397_v31 = vmul.f32 %v708_v50, %v912_v54 }
 0x1ed   :  { %v391_v55 = vmul.f32 %v710_v51, %v910_v53  ;;  %v351_v59 = vpop.xlane.xlu2 %350 }
 0x1ee   :  { %v407_v56 = vpack.c.bf16 %v397_v31, %v396_v57  ;;  %711 = vrcp.f32 %v351_v59 }
 0x1ef   :  { %v404_v58 = vpack.c.bf16 %v391_v55, %v390_v38  ;;  %713 = vrcp.f32 %v363_v52 }
 0x1f0   :  { %491 = vmatmul.bf16.vlgmr.msra.gmra.mxu3 %v407_v56 }
 0x1f1   :  { %476 = vmatmul.bf16.gmra.mxu1 %v404_v58 }
 0x1f4   :  { %v353_v60 = vpop.xlane.xlu0 %352  ;;  %v712_v0 = vpop.eup %711 }
 0x1f5   :  { %715 = vrcp.f32 %v353_v60  ;;  %v365_v61 = vpop.xlane.xlu1 %364  ;;  %v714_v1 = vpop.eup %713  ;;  %v392_v54 = vmul.f32 %v712_v0, %v924_v62 }
 0x1f6   :  { %717 = vrcp.f32 %v365_v61  ;;  %v398_v53 = vmul.f32 %v714_v1, %v926_v63 }
 0x1fb   :  { %v716_v47 = vpop.eup %715 }
 0x1fc   :  { %v718_v4 = vpop.eup %717  ;;  %v393_v43 = vmul.f32 %v716_v47, %v934_v5 }
 0x1fd   :  { %v399_v2 = vmul.f32 %v718_v4, %v936_v7  ;;  %v367_v9 = vpop.xlane.xlu1 %366 }
 0x1fe   :  { %v405_v3 = vpack.c.bf16 %v393_v43, %v392_v54  ;;  %719 = vrcp.f32 %v367_v9 }
 0x1ff   :  { %v408_v6 = vpack.c.bf16 %v399_v2, %v398_v53 }
 0x201   :  { %481 = vmatmul.bf16.gmra.mxu1 %v405_v3  ;;  %496 = vmatmul.bf16.gmra.mxu3 %v408_v6 }
 0x204   :  { %v720_v14 = vpop.eup %719 }
 0x205   :  { %v357_v13 = vpop.xlane.xlu1 %356  ;;  %v400_v62 = vmul.f32 %v720_v14, %v941_v12 }
 0x23d   :  { %v369_v11 = vpop.xlane.xlu2 %368 }
 0x23e   :  { %721 = vrcp.f32 %v369_v11 }
 0x23f   :  { %723 = vrcp.f32 %v357_v13 }
 0x244   :  { %v722_v15 = vpop.eup %721 }
 0x245   :  { %v355_v10 = vpop.xlane.xlu0 %354  ;;  %v401_v5 = vmul.f32 %v722_v15, %v966_v32  ;;  %v724_v16 = vpop.eup %723 }
 0x246   :  { %725 = vrcp.f32 %v355_v10  ;;  %v395_v22 = vmul.f32 %v724_v16, %v944_v8 }
 0x247   :  { %v467_v63 = vpop.f32.mrf.mxu1  ;;  %v409_v7 = vpack.c.bf16 %v401_v5, %v400_v62 }
 0x248   :  { %507 = vst [vmem:[%s1037_s3] sm:$0xff] %v467_v63 }
 0x249   :  { %501 = vmatmul.bf16.gmra.mxu3 %v409_v7 }
 0x24c   :  { %v726_v19 = vpop.eup %725 }
 0x24d   :  { %v394_v20 = vmul.f32 %v726_v19, %v969_v17 }
 0x24f   :  { %v469_v23 = vpop.f32.mrf.mxu1  ;;  %v406_v24 = vpack.c.bf16 %v395_v22, %v394_v20 }
 0x250   :  { %508 = vst [vmem:[%s1037_s3 + $0x8] sm:$0xff] %v469_v23 }
 0x251   :  { %486 = vmatmul.bf16.gmra.mxu1 %v406_v24 }
 0x257   :  { %v472_v12 = vpop.f32.mrf.mxu1 }
 0x258   :  { %509 = vst [vmem:[%s1037_s3 + $0x10] sm:$0xff] %v472_v12 }
 0x25f   :  { %v474_v21 = vpop.f32.mrf.mxu1 }
 0x260   :  { %510 = vst [vmem:[%s1037_s3 + $0x18] sm:$0xff] %v474_v21 }
 0x26e   :  { %v477_v27 = vpop.f32.mrf.mxu1 }
 0x26f   :  { %511 = vst [vmem:[%s1037_s3 + $0x20] sm:$0xff] %v477_v27 }
 0x273   :  { %v492_v8 = vpop.f32.mrf.mxu3 }
 0x274   :  { %517 = vst [vmem:[%s1037_s3 + $0x50] sm:$0xff] %v492_v8 }
 0x276   :  { %v479_v26 = vpop.f32.mrf.mxu1 }
 0x277   :  { %512 = vst [vmem:[%s1037_s3 + $0x28] sm:$0xff] %v479_v26 }
 0x27b   :  { %v494_v29 = vpop.f32.mrf.mxu3 }
 0x27c   :  { %518 = vst [vmem:[%s1037_s3 + $0x58] sm:$0xff] %v494_v29 }
 0x27e   :  { %v482_v30 = vpop.f32.mrf.mxu1 }
 0x27f   :  { %513 = vst [vmem:[%s1037_s3 + $0x30] sm:$0xff] %v482_v30 }
 0x284   :  { %v497_v33 = vpop.f32.mrf.mxu3 }
 0x285   :  { %519 = vst [vmem:[%s1037_s3 + $0x60] sm:$0xff] %v497_v33 }
 0x286   :  { %v484_v35 = vpop.f32.mrf.mxu1 }
 0x287   :  { %514 = vst [vmem:[%s1037_s3 + $0x38] sm:$0xff] %v484_v35 }
 0x28c   :  { %v499_v37 = vpop.f32.mrf.mxu3 }
 0x28d   :  { %520 = vst [vmem:[%s1037_s3 + $0x68] sm:$0xff] %v499_v37 }
 0x2cc   :  { %v502_v32 = vpop.f32.mrf.mxu3 }
 0x2cd   :  { %521 = vst [vmem:[%s1037_s3 + $0x70] sm:$0xff] %v502_v32 }
 0x2ce   :  { %v487_v36 = vpop.f32.mrf.mxu1 }
 0x2cf   :  { %515 = vst [vmem:[%s1037_s3 + $0x40] sm:$0xff] %v487_v36 }
 0x2d4   :  { %v504_v39 = vpop.f32.mrf.mxu3 }
 0x2d5   :  { %522 = vst [vmem:[%s1037_s3 + $0x78] sm:$0xff] %v504_v39 }
 0x2d6   :  { %v489_v28 = vpop.f32.mrf.mxu1 }
 0x2d7   :  { %516 = vst [vmem:[%s1037_s3 + $0x48] sm:$0xff] %v489_v28 }

// kernel: graph_conflator_forward.25
= control target key start
LH: loop header
LB: loop body
LE: loop exit
PB: predicated region body
PF: predicated region fallthrough
CT: control target
= control target key end

     0   :  { %s528_s1 = inlined_call_operand.vmem [shape: f32[128,128], index: 1, kind: input, shape index: {}, may-alias: {0,1}]   ;;  %s529_s3 = inlined_call_operand.vmem [shape: f32[128,128], index: 3, kind: input, shape index: {}, may-alias: {2,3}]   ;;  %s530_s2 = inlined_call_operand.vmem [shape: f32[128,128], index: 2, kind: input, shape index: {}, may-alias: {2,3}]   ;;  %s531_s0 = inlined_call_operand.vmem [shape: f32[128,128], index: 0, kind: input, shape index: {}, may-alias: {0,1}]   ;;  %s532_s4 = inlined_call_operand.vmem [shape: f32[128,128], index: 4, kind: output, shape index: {}]  }
   0x1   :  { %v95_v0 = vld [vmem:[%s528_s1 + $0x70] sm:$0xff]  ;;  %v96_v1 = vld [vmem:[%s528_s1 + $0x78] sm:$0xff]  ;;  %v93_v6 = vld [vmem:[%s528_s1 + $0x60] sm:$0xff] }
   0x2   :  { %v47_v2 = vld [vmem:[%s529_s3 + $0x70] sm:$0xff]  ;;  %v112_v3 = vpack.c.bf16 %v96_v1, %v95_v0  ;;  %v48_v4 = vld [vmem:[%s529_s3 + $0x78] sm:$0xff]  ;;  %v94_v7 = vld [vmem:[%s528_s1 + $0x68] sm:$0xff] }
   0x3   :  { %v64_v5 = vpack.c.bf16 %v48_v4, %v47_v2  ;;  %v45_v8 = vld [vmem:[%s529_s3 + $0x60] sm:$0xff]  ;;  %v46_v9 = vld [vmem:[%s529_s3 + $0x68] sm:$0xff]  ;;  %v111_v10 = vpack.c.bf16 %v94_v7, %v93_v6  ;;  %v91_v12 = vld [vmem:[%s528_s1 + $0x50] sm:$0xff] }
   0x4   :  { %113 = vmatpush.bf16.xpose.msra.mxu0 %v112_v3  ;;  %247 = vmatpush.bf16.xpose.msra.mxu2 %v112_v3  ;;  %v63_v11 = vpack.c.bf16 %v46_v9, %v45_v8  ;;  %v92_v13 = vld [vmem:[%s528_s1 + $0x58] sm:$0xff]  ;;  %v43_v14 = vld [vmem:[%s529_s3 + $0x50] sm:$0xff]  ;;  %v89_v18 = vld [vmem:[%s528_s1 + $0x40] sm:$0xff] }
   0x5   :  { %162 = vmatpush.bf16.xpose.msra.mxu1 %v64_v5  ;;  %255 = vmatpush.bf16.xpose.msra.mxu3 %v64_v5  ;;  %v44_v15 = vld [vmem:[%s529_s3 + $0x58] sm:$0xff]  ;;  %v110_v16 = vpack.c.bf16 %v92_v13, %v91_v12  ;;  %v90_v19 = vld [vmem:[%s528_s1 + $0x48] sm:$0xff]  ;;  %v41_v20 = vld [vmem:[%s529_s3 + $0x40] sm:$0xff] }
   0x6   :  { %v62_v17 = vpack.c.bf16 %v44_v15, %v43_v14  ;;  %v42_v21 = vld [vmem:[%s529_s3 + $0x48] sm:$0xff]  ;;  %v109_v22 = vpack.c.bf16 %v90_v19, %v89_v18  ;;  %v87_v24 = vld [vmem:[%s528_s1 + $0x30] sm:$0xff]  ;;  %v88_v25 = vld [vmem:[%s528_s1 + $0x38] sm:$0xff] }
   0x7   :  { %v61_v23 = vpack.c.bf16 %v42_v21, %v41_v20  ;;  %v39_v26 = vld [vmem:[%s529_s3 + $0x30] sm:$0xff]  ;;  %v40_v27 = vld [vmem:[%s529_s3 + $0x38] sm:$0xff]  ;;  %v108_v28 = vpack.c.bf16 %v88_v25, %v87_v24  ;;  %v85_v30 = vld [vmem:[%s528_s1 + $0x20] sm:$0xff] }
   0x8   :  { %v60_v29 = vpack.c.bf16 %v40_v27, %v39_v26  ;;  %v86_v31 = vld [vmem:[%s528_s1 + $0x28] sm:$0xff]  ;;  %v37_v32 = vld [vmem:[%s529_s3 + $0x20] sm:$0xff]  ;;  %v83_v36 = vld [vmem:[%s528_s1 + $0x10] sm:$0xff] }
   0x9   :  { %v38_v33 = vld [vmem:[%s529_s3 + $0x28] sm:$0xff]  ;;  %v107_v34 = vpack.c.bf16 %v86_v31, %v85_v30  ;;  %v84_v37 = vld [vmem:[%s528_s1 + $0x18] sm:$0xff]  ;;  %v35_v38 = vld [vmem:[%s529_s3 + $0x10] sm:$0xff] }
   0xa   :  { %v59_v35 = vpack.c.bf16 %v38_v33, %v37_v32  ;;  %v36_v39 = vld [vmem:[%s529_s3 + $0x18] sm:$0xff]  ;;  %v106_v40 = vpack.c.bf16 %v84_v37, %v83_v36  ;;  %v81_v42 = vld [vmem:[%s528_s1] sm:$0xff]  ;;  %v82_v43 = vld [vmem:[%s528_s1 + $0x8] sm:$0xff] }
   0xb   :  { %v58_v41 = vpack.c.bf16 %v36_v39, %v35_v38  ;;  %v33_v44 = vld [vmem:[%s529_s3] sm:$0xff]  ;;  %v34_v45 = vld [vmem:[%s529_s3 + $0x8] sm:$0xff]  ;;  %v105_v46 = vpack.c.bf16 %v82_v43, %v81_v42  ;;  %v67_v60 = vld [vmem:[%s530_s2 + $0x10] sm:$0xff] }
   0xc   :  { %114 = vmatpush.bf16.xpose.msra.mxu0 %v111_v10  ;;  %248 = vmatpush.bf16.xpose.msra.mxu2 %v111_v10  ;;  %v57_v47 = vpack.c.bf16 %v34_v45, %v33_v44  ;;  %v65_v48 = vld [vmem:[%s530_s2] sm:$0xff]  ;;  %v66_v49 = vld [vmem:[%s530_s2 + $0x8] sm:$0xff]  ;;  %v68_v61 = vld [vmem:[%s530_s2 + $0x18] sm:$0xff] }
   0xd   :  { %163 = vmatpush.bf16.xpose.msra.mxu1 %v63_v11  ;;  %256 = vmatpush.bf16.xpose.msra.mxu3 %v63_v11  ;;  %v73_v50 = vld [vmem:[%s530_s2 + $0x40] sm:$0xff]  ;;  %v74_v51 = vld [vmem:[%s530_s2 + $0x48] sm:$0xff]  ;;  %v97_v56 = vpack.c.bf16 %v66_v49, %v65_v48  ;;  %v75_v62 = vld [vmem:[%s530_s2 + $0x50] sm:$0xff]  ;;  %v98_v4 = vpack.c.bf16 %v68_v61, %v67_v60 }
   0xe   :  { %v17_v52 = vld [vmem:[%s531_s0] sm:$0xff]  ;;  %v18_v53 = vld [vmem:[%s531_s0 + $0x8] sm:$0xff]  ;;  %v101_v57 = vpack.c.bf16 %v74_v51, %v73_v50  ;;  %v76_v63 = vld [vmem:[%s530_s2 + $0x58] sm:$0xff] }
   0xf   :  { %v25_v54 = vld [vmem:[%s531_s0 + $0x40] sm:$0xff]  ;;  %v26_v55 = vld [vmem:[%s531_s0 + $0x48] sm:$0xff]  ;;  %v49_v58 = vpack.c.bf16 %v18_v53, %v17_v52  ;;  %v19_v0 = vld [vmem:[%s531_s0 + $0x10] sm:$0xff]  ;;  %v102_v5 = vpack.c.bf16 %v76_v63, %v75_v62 }
  0x10   :  { %v53_v59 = vpack.c.bf16 %v26_v55, %v25_v54  ;;  %v20_v1 = vld [vmem:[%s531_s0 + $0x18] sm:$0xff]  ;;  %v27_v2 = vld [vmem:[%s531_s0 + $0x50] sm:$0xff]  ;;  %v69_v8 = vld [vmem:[%s530_s2 + $0x20] sm:$0xff] }
  0x11   :  { %v28_v3 = vld [vmem:[%s531_s0 + $0x58] sm:$0xff]  ;;  %v50_v6 = vpack.c.bf16 %v20_v1, %v19_v0  ;;  %v70_v9 = vld [vmem:[%s530_s2 + $0x28] sm:$0xff]  ;;  %v77_v10 = vld [vmem:[%s530_s2 + $0x60] sm:$0xff] }
  0x12   :  { %v54_v7 = vpack.c.bf16 %v28_v3, %v27_v2  ;;  %v78_v11 = vld [vmem:[%s530_s2 + $0x68] sm:$0xff]  ;;  %v21_v12 = vld [vmem:[%s531_s0 + $0x20] sm:$0xff]  ;;  %v71_v20 = vld [vmem:[%s530_s2 + $0x30] sm:$0xff] }
  0x13   :  { %v22_v13 = vld [vmem:[%s531_s0 + $0x28] sm:$0xff]  ;;  %v29_v14 = vld [vmem:[%s531_s0 + $0x60] sm:$0xff]  ;;  %v72_v21 = vld [vmem:[%s530_s2 + $0x38] sm:$0xff] }
  0x14   :  { %115 = vmatpush.bf16.xpose.msra.mxu0 %v110_v16  ;;  %249 = vmatpush.bf16.xpose.msra.mxu2 %v110_v16  ;;  %v30_v15 = vld [vmem:[%s531_s0 + $0x68] sm:$0xff]  ;;  %v99_v16 = vpack.c.bf16 %v70_v9, %v69_v8  ;;  %v51_v18 = vpack.c.bf16 %v22_v13, %v21_v12  ;;  %v23_v24 = vld [vmem:[%s531_s0 + $0x30] sm:$0xff]  ;;  %v24_v25 = vld [vmem:[%s531_s0 + $0x38] sm:$0xff] }
  0x15   :  { %164 = vmatpush.bf16.xpose.msra.mxu1 %v62_v17  ;;  %257 = vmatpush.bf16.xpose.msra.mxu3 %v62_v17  ;;  %v103_v17 = vpack.c.bf16 %v78_v11, %v77_v10  ;;  %v55_v19 = vpack.c.bf16 %v30_v15, %v29_v14  ;;  %v31_v26 = vld [vmem:[%s531_s0 + $0x70] sm:$0xff]  ;;  %v32_v27 = vld [vmem:[%s531_s0 + $0x78] sm:$0xff]  ;;  %v52_v30 = vpack.c.bf16 %v24_v25, %v23_v24 }
  0x16   :  { %v56_v31 = vpack.c.bf16 %v32_v27, %v31_v26 }
  0x1c   :  { %116 = vmatpush.bf16.xpose.msra.mxu0 %v109_v22  ;;  %250 = vmatpush.bf16.xpose.msra.mxu2 %v109_v22  ;;  %v79_v22 = vld [vmem:[%s530_s2 + $0x70] sm:$0xff] }
  0x1d   :  { %165 = vmatpush.bf16.xpose.msra.mxu1 %v61_v23  ;;  %258 = vmatpush.bf16.xpose.msra.mxu3 %v61_v23  ;;  %v80_v23 = vld [vmem:[%s530_s2 + $0x78] sm:$0xff] }
  0x24   :  { %117 = vmatpush.bf16.xpose.msra.mxu0 %v108_v28  ;;  %251 = vmatpush.bf16.xpose.msra.mxu2 %v108_v28  ;;  %v100_v28 = vpack.c.bf16 %v72_v21, %v71_v20 }
  0x25   :  { %166 = vmatpush.bf16.xpose.msra.mxu1 %v60_v29  ;;  %259 = vmatpush.bf16.xpose.msra.mxu3 %v60_v29  ;;  %v104_v29 = vpack.c.bf16 %v80_v23, %v79_v22 }
  0x2c   :  { %118 = vmatpush.bf16.xpose.msra.mxu0 %v107_v34  ;;  %252 = vmatpush.bf16.xpose.msra.mxu2 %v107_v34 }
  0x2d   :  { %167 = vmatpush.bf16.xpose.msra.mxu1 %v59_v35  ;;  %260 = vmatpush.bf16.xpose.msra.mxu3 %v59_v35 }
  0x34   :  { %119 = vmatpush.bf16.xpose.msra.mxu0 %v106_v40  ;;  %253 = vmatpush.bf16.xpose.msra.mxu2 %v106_v40 }
  0x35   :  { %168 = vmatpush.bf16.xpose.msra.mxu1 %v58_v41  ;;  %261 = vmatpush.bf16.xpose.msra.mxu3 %v58_v41 }
  0x3c   :  { %120 = vmatpush.bf16.xpose.msra.mxu0 %v105_v46  ;;  %254 = vmatpush.bf16.xpose.msra.mxu2 %v105_v46 }
  0x3d   :  { %169 = vmatpush.bf16.xpose.msra.mxu1 %v57_v47  ;;  %262 = vmatpush.bf16.xpose.msra.mxu3 %v57_v47 }
  0x43   :  { %121 = vmatmul.bf16.vlgmr.msra.gmra.mxu0 %v97_v56  ;;  %141 = vmatmul.bf16.vlgmr.msra.gmra.mxu2 %v101_v57 }
  0x44   :  { %170 = vmatmul.bf16.vlgmr.msra.gmra.mxu1 %v49_v58  ;;  %190 = vmatmul.bf16.vlgmr.msra.gmra.mxu3 %v53_v59 }
  0x53   :  { %126 = vmatmul.bf16.gmra.mxu0 %v98_v4  ;;  %146 = vmatmul.bf16.gmra.mxu2 %v102_v5 }
  0x54   :  { %175 = vmatmul.bf16.gmra.mxu1 %v50_v6  ;;  %195 = vmatmul.bf16.gmra.mxu3 %v54_v7 }
  0x63   :  { %131 = vmatmul.bf16.gmra.mxu0 %v99_v16  ;;  %151 = vmatmul.bf16.gmra.mxu2 %v103_v17 }
  0x64   :  { %180 = vmatmul.bf16.gmra.mxu1 %v51_v18  ;;  %200 = vmatmul.bf16.gmra.mxu3 %v55_v19 }
  0x73   :  { %136 = vmatmul.bf16.gmra.mxu0 %v100_v28  ;;  %156 = vmatmul.bf16.gmra.mxu2 %v104_v29 }
  0x74   :  { %185 = vmatmul.bf16.gmra.mxu1 %v52_v30  ;;  %205 = vmatmul.bf16.gmra.mxu3 %v56_v31 }
  0xc0   :  { %v122_v32 = vpop.f32.mrf.mxu0 }
  0xc1   :  { %v171_v33 = vpop.f32.mrf.mxu1 }
  0xc2   :  { %v172_v34 = vadd.f32 %v171_v33, %v122_v32 }
  0xc4   :  { %v211_v35 = vmul.f32 0.5, %v172_v34 }
  0xc6   :  { %227 = vst [vmem:[%s532_s4] sm:$0xff] %v211_v35  ;;  %v142_v36 = vpop.f32.mrf.mxu2 }
  0xc7   :  { %v191_v37 = vpop.f32.mrf.mxu3 }
  0xc8   :  { %v192_v38 = vadd.f32 %v191_v37, %v142_v36  ;;  %v124_v39 = vpop.f32.mrf.mxu0 }
  0xc9   :  { %v173_v40 = vpop.f32.mrf.mxu1 }
  0xca   :  { %v219_v41 = vmul.f32 0.5, %v192_v38  ;;  %v174_v42 = vadd.f32 %v173_v40, %v124_v39 }
  0xcc   :  { %235 = vst [vmem:[%s532_s4 + $0x40] sm:$0xff] %v219_v41  ;;  %v212_v43 = vmul.f32 0.5, %v174_v42 }
  0xce   :  { %228 = vst [vmem:[%s532_s4 + $0x8] sm:$0xff] %v212_v43  ;;  %v144_v44 = vpop.f32.mrf.mxu2 }
  0xcf   :  { %v193_v45 = vpop.f32.mrf.mxu3 }
  0xd0   :  { %v194_v46 = vadd.f32 %v193_v45, %v144_v44  ;;  %v127_v47 = vpop.f32.mrf.mxu0 }
  0xd1   :  { %v176_v48 = vpop.f32.mrf.mxu1 }
  0xd2   :  { %v220_v49 = vmul.f32 0.5, %v194_v46  ;;  %v177_v50 = vadd.f32 %v176_v48, %v127_v47 }
  0xd4   :  { %236 = vst [vmem:[%s532_s4 + $0x48] sm:$0xff] %v220_v49  ;;  %v213_v51 = vmul.f32 0.5, %v177_v50 }
  0xd6   :  { %229 = vst [vmem:[%s532_s4 + $0x10] sm:$0xff] %v213_v51  ;;  %v147_v52 = vpop.f32.mrf.mxu2 }
  0xd7   :  { %v196_v53 = vpop.f32.mrf.mxu3 }
  0xd8   :  { %v197_v54 = vadd.f32 %v196_v53, %v147_v52  ;;  %v129_v55 = vpop.f32.mrf.mxu0 }
  0xd9   :  { %v178_v56 = vpop.f32.mrf.mxu1 }
  0xda   :  { %v221_v57 = vmul.f32 0.5, %v197_v54  ;;  %v179_v58 = vadd.f32 %v178_v56, %v129_v55 }
  0xdc   :  { %237 = vst [vmem:[%s532_s4 + $0x50] sm:$0xff] %v221_v57  ;;  %v214_v59 = vmul.f32 0.5, %v179_v58 }
  0xde   :  { %230 = vst [vmem:[%s532_s4 + $0x18] sm:$0xff] %v214_v59  ;;  %v149_v60 = vpop.f32.mrf.mxu2 }
  0xdf   :  { %v198_v61 = vpop.f32.mrf.mxu3 }
  0xe0   :  { %v199_v62 = vadd.f32 %v198_v61, %v149_v60  ;;  %v132_v63 = vpop.f32.mrf.mxu0 }
  0xe1   :  { %v181_v0 = vpop.f32.mrf.mxu1 }
  0xe2   :  { %v222_v1 = vmul.f32 0.5, %v199_v62  ;;  %v182_v2 = vadd.f32 %v181_v0, %v132_v63 }
  0xe4   :  { %238 = vst [vmem:[%s532_s4 + $0x58] sm:$0xff] %v222_v1  ;;  %v215_v3 = vmul.f32 0.5, %v182_v2 }
  0xe6   :  { %231 = vst [vmem:[%s532_s4 + $0x20] sm:$0xff] %v215_v3  ;;  %v152_v4 = vpop.f32.mrf.mxu2 }
  0xe7   :  { %v201_v5 = vpop.f32.mrf.mxu3 }
  0xe8   :  { %v202_v6 = vadd.f32 %v201_v5, %v152_v4  ;;  %v134_v7 = vpop.f32.mrf.mxu0 }
  0xe9   :  { %v183_v8 = vpop.f32.mrf.mxu1 }
  0xea   :  { %v223_v9 = vmul.f32 0.5, %v202_v6  ;;  %v184_v10 = vadd.f32 %v183_v8, %v134_v7 }
  0xec   :  { %239 = vst [vmem:[%s532_s4 + $0x60] sm:$0xff] %v223_v9  ;;  %v216_v11 = vmul.f32 0.5, %v184_v10 }
  0xee   :  { %232 = vst [vmem:[%s532_s4 + $0x28] sm:$0xff] %v216_v11  ;;  %v154_v12 = vpop.f32.mrf.mxu2 }
  0xef   :  { %v203_v13 = vpop.f32.mrf.mxu3 }
  0xf0   :  { %v204_v14 = vadd.f32 %v203_v13, %v154_v12  ;;  %v137_v15 = vpop.f32.mrf.mxu0 }
  0xf1   :  { %v186_v16 = vpop.f32.mrf.mxu1 }
  0xf2   :  { %v224_v17 = vmul.f32 0.5, %v204_v14  ;;  %v187_v18 = vadd.f32 %v186_v16, %v137_v15 }
  0xf4   :  { %240 = vst [vmem:[%s532_s4 + $0x68] sm:$0xff] %v224_v17  ;;  %v217_v19 = vmul.f32 0.5, %v187_v18 }
  0xf6   :  { %233 = vst [vmem:[%s532_s4 + $0x30] sm:$0xff] %v217_v19  ;;  %v157_v20 = vpop.f32.mrf.mxu2 }
  0xf7   :  { %v206_v21 = vpop.f32.mrf.mxu3 }
  0xf8   :  { %v207_v22 = vadd.f32 %v206_v21, %v157_v20  ;;  %v139_v23 = vpop.f32.mrf.mxu0 }
  0xf9   :  { %v188_v24 = vpop.f32.mrf.mxu1 }
  0xfa   :  { %v225_v25 = vmul.f32 0.5, %v207_v22  ;;  %v189_v26 = vadd.f32 %v188_v24, %v139_v23 }
  0xfc   :  { %241 = vst [vmem:[%s532_s4 + $0x70] sm:$0xff] %v225_v25  ;;  %v218_v27 = vmul.f32 0.5, %v189_v26 }
  0xfe   :  { %234 = vst [vmem:[%s532_s4 + $0x38] sm:$0xff] %v218_v27  ;;  %v159_v28 = vpop.f32.mrf.mxu2 }
  0xff   :  { %v208_v29 = vpop.f32.mrf.mxu3 }
 0x100   :  { %v209_v30 = vadd.f32 %v208_v29, %v159_v28 }
 0x102   :  { %v226_v31 = vmul.f32 0.5, %v209_v30 }
 0x104   :  { %242 = vst [vmem:[%s532_s4 + $0x78] sm:$0xff] %v226_v31 }

</bundles_post_ra>
